<compile_context>
chip_gen: v5e
topology: v5e:2x2
jax: 0.10.0
libtpu: 0.0.40
codegen_flags: <defaults>
</compile_context>

<pallas_src>
import functools

import jax
import jax.numpy as jnp
from jax import lax
from jax.experimental import pallas as pl
from jax.experimental.pallas import tpu as pltpu


def _cdiv(a: int, b: int) -> int:
    return -(-a // b)


def _round_up(n: int, m: int) -> int:
    return _cdiv(n, m) * m


def _choose_tiling(batch: int, tile_b: int):
    """Pad batch only to a multiple of 128 and split it into equal lane-aligned tiles so the
    last tile is never mostly padding.  Keep >= 2 tiles when there is enough work so the
    'parallel' grid axis can use both TensorCores on v7x (harmless 1-TC loop on v5e/v6e)."""
    batch_128 = _round_up(max(batch, 1), 128)
    tb_cap = _round_up(max(min(tile_b, batch_128), 128), 128)
    if batch_128 >= 256:
        tb_cap = min(tb_cap, _round_up(_cdiv(batch_128, 2), 128))
    num_tiles = _cdiv(batch_128, tb_cap)
    tb = _round_up(_cdiv(batch_128, num_tiles), 128)   # <= tb_cap; padding < 128 per tile
    batch_p = tb * num_tiles
    return tb, num_tiles, batch_p


def fcn_kernel(x_ref, w1_ref, b1_ref, w2_ref, b2_ref, w3_ref, b3_ref, o_ref, *, vpu_head):
    """o = W3 @ relu(W2 @ relu(W1 @ x^T + b1) + b2) + b3, with batch on the lane axis.

    x_ref tile is (TB, in_dim); the first matmul contracts in_dim of both operands
    ('od,bd->ob'), so no transpose of x is needed anywhere."""
    x = x_ref[...]                                                     # (TB, in)
    h = lax.dot_general(
        w1_ref[...], x.astype(w1_ref.dtype),
        dimension_numbers=(((1,), (1,)), ((), ())),                    # contract in_dim/in_dim
        preferred_element_type=jnp.float32,
    )
    h = jnp.maximum(h + b1_ref[...], 0.0)                              # (H, TB) f32
    h = jnp.dot(w2_ref[...], h.astype(w2_ref.dtype),
                preferred_element_type=jnp.float32)
    h = jnp.maximum(h + b2_ref[...], 0.0)                              # (H, TB) f32

    if vpu_head:
        # Tiny head: w3_ref is (H, out_dim).  A full MXU pass for out_dim rows wastes almost
        # an entire contraction; do it as a VPU multiply + sublane (XLU) reduction instead.
        w3 = w3_ref[...].astype(jnp.float32)
        cols = [jnp.sum(h * w3[:, j:j + 1], axis=0, keepdims=True)     # (1, TB) each
                for j in range(w3.shape[1])]
        o = (cols[0] if len(cols) == 1 else jnp.concatenate(cols, axis=0)) + b3_ref[...]
    else:
        o = jnp.dot(w3_ref[...], h.astype(w3_ref.dtype),
                    preferred_element_type=jnp.float32) + b3_ref[...]
    o_ref[...] = o.astype(o_ref.dtype)                                 # (out_dim, TB) lane-dense


def fcn_forward(x, params, *, tile_b=4096, compute_dtype=None):
    """params: [(W1,b1),(W2,b2),(W3,b3)] in PyTorch layout W=(out,in), b=(out,).
    Returns (batch, out_dim), matching FullyConnectedNetwork.forward.
    compute_dtype=jnp.bfloat16 feeds the MXU in bf16 (f32 accumulation) on v6e/v7x."""
    (w1, b1), (w2, b2), (w3, b3) = params
    batch, in_dim = x.shape
    out_dim = w3.shape[0]
    vpu_head = out_dim <= 8

    tb, num_tiles, batch_p = _choose_tiling(batch, tile_b)
    xp = x if batch_p == batch else jnp.pad(x, ((0, batch_p - batch), (0, 0)))

    wd = compute_dtype if compute_dtype is not None else w1.dtype
    w1c = w1.astype(wd)
    w2c = w2.astype(wd)
    w3c = (w3.T if vpu_head else w3).astype(wd)        # (H, out_dim) column(s) for the VPU head
    # Biases as f32 columns so they broadcast along the lane (batch) axis in-kernel.
    b1c = b1.astype(jnp.float32).reshape(-1, 1)
    b2c = b2.astype(jnp.float32).reshape(-1, 1)
    b3c = b3.astype(jnp.float32).reshape(-1, 1)

    resident = lambda i: (0, 0)   # constant block index -> weights stay VMEM-resident
    kernel = functools.partial(fcn_kernel, vpu_head=vpu_head)

    out_t = pl.pallas_call(
        kernel,
        out_shape=jax.ShapeDtypeStruct((out_dim, batch_p), x.dtype),
        grid=(num_tiles,),
        in_specs=[
            pl.BlockSpec((tb, in_dim), lambda i: (i, 0)),   # x tile (double-buffered)
            pl.BlockSpec(w1c.shape, resident),
            pl.BlockSpec(b1c.shape, resident),
            pl.BlockSpec(w2c.shape, resident),
            pl.BlockSpec(b2c.shape, resident),
            pl.BlockSpec(w3c.shape, resident),
            pl.BlockSpec(b3c.shape, resident),
        ],
        out_specs=pl.BlockSpec((out_dim, tb), lambda i: (0, i)),   # lane-dense output
        compiler_params=pltpu.CompilerParams(
            dimension_semantics=("parallel",),        # batch tiles shard across TCs on v7x
            vmem_limit_bytes=32 * 1024 * 1024,        # headroom over v5e's 16 MiB default
        ),
    )(xp, w1c, b1c, w2c, b2c, w3c, b3c)

    return out_t[:, :batch].T    # (batch, out_dim); tiny transpose for small out_dim


def init_fcn_params(key, input_dim, output_dim, n_layers=2, hidden=256):
    """Mirror the module (orthogonal_init=False): hidden layers nn.Linear default init,
    last layer xavier_uniform(gain=0.01), bias 0."""
    params = []
    d = input_dim
    for _ in range(n_layers):
        key, kw, kb = jax.random.split(key, 3)
        bound = 1.0 / (d ** 0.5)
        w = jax.random.uniform(kw, (hidden, d), jnp.float32, -bound, bound)
        b = jax.random.uniform(kb, (hidden,), jnp.float32, -bound, bound)
        params.append((w, b))
        d = hidden
    key, kw = jax.random.split(key)
    bound = 0.01 * (6.0 / (d + output_dim)) ** 0.5
    w_last = jax.random.uniform(kw, (output_dim, d), jnp.float32, -bound, bound)
    b_last = jnp.zeros((output_dim,), jnp.float32)
    params.append((w_last, b_last))
    return params


def fcn_reference(x, params):
    h = x
    n = len(params)
    for i, (w, b) in enumerate(params):
        h = h @ w.T + b
        if i < n - 1:
            h = jnp.maximum(h, 0.0)
    return h


if __name__ == "__main__":
    # FullyConnectedNetwork(input_dim=17, output_dim=1, n_layers=2) -- halfcheetah-style head.
    input_dim, output_dim, n_layers = 17, 1, 2
    batch = 300   # deliberately NOT a multiple of 128: exercises 128-padding + 2-tile grid

    key = jax.random.PRNGKey(0)
    key, kx = jax.random.split(key)
    x = jax.random.normal(kx, (batch, input_dim), jnp.float32)
    params = init_fcn_params(key, input_dim, output_dim, n_layers)

    fwd = jax.jit(fcn_forward)          # default tile_b=4096; tiler picks tb=256, grid=(2,)
    out = jax.block_until_ready(fwd(x, params))

    ref = fcn_reference(x, params)
    assert out.shape == (batch, output_dim), out.shape
    assert jnp.allclose(out, ref, atol=1e-4, rtol=1e-4), (out, ref)

    print("KERNEL_OK")
</pallas_src>

<mosaic_0001>
module attributes {stable_mosaic.version = 11 : i64} {
  func.func @fcn_kernel(%arg0: i32, %arg1: memref<256x17xf32, #tpu.memory_space<vmem>>, %arg2: memref<256x17xf32, #tpu.memory_space<vmem>>, %arg3: memref<256x1xf32, #tpu.memory_space<vmem>>, %arg4: memref<256x256xf32, #tpu.memory_space<vmem>>, %arg5: memref<256x1xf32, #tpu.memory_space<vmem>>, %arg6: memref<256x1xf32, #tpu.memory_space<vmem>>, %arg7: memref<1x1xf32, #tpu.memory_space<vmem>>, %arg8: memref<1x256xf32, #tpu.memory_space<vmem>>) attributes {dimension_semantics = [#tpu.dimension_semantics<parallel>], iteration_bounds = array<i64: 2>, scalar_prefetch = 0 : i64, scratch_operands = 0 : i64, tpu.core_type = #tpu.core_type<tc>, window_params = [{transform_indices = @transform_0, window_bounds = array<i64: 256, 17>}, {pipeline_mode = #tpu.pipeline_mode<synchronous>, transform_indices = @transform_1, window_bounds = array<i64: 256, 17>}, {pipeline_mode = #tpu.pipeline_mode<synchronous>, transform_indices = @transform_2, window_bounds = array<i64: 256, 1>}, {pipeline_mode = #tpu.pipeline_mode<synchronous>, transform_indices = @transform_3, window_bounds = array<i64: 256, 256>}, {pipeline_mode = #tpu.pipeline_mode<synchronous>, transform_indices = @transform_4, window_bounds = array<i64: 256, 1>}, {pipeline_mode = #tpu.pipeline_mode<synchronous>, transform_indices = @transform_5, window_bounds = array<i64: 256, 1>}, {pipeline_mode = #tpu.pipeline_mode<synchronous>, transform_indices = @transform_6, window_bounds = array<i64: 1, 1>}, {transform_indices = @transform_7, window_bounds = array<i64: 1, 256>}]} {
    %c0 = arith.constant 0 : index
    %c0_0 = arith.constant 0 : index
    %0 = vector.load %arg1[%c0, %c0_0] : memref<256x17xf32, #tpu.memory_space<vmem>>, vector<256x17xf32>
    %c0_1 = arith.constant 0 : index
    %c0_2 = arith.constant 0 : index
    %1 = vector.load %arg2[%c0_1, %c0_2] : memref<256x17xf32, #tpu.memory_space<vmem>>, vector<256x17xf32>
    %cst = arith.constant dense<0.000000e+00> : vector<256x256xf32>
    %2 = tpu.matmul %1, %0, %cst {dimension_numbers = #tpu.dot_dimension_numbers<[1], [1], [0], [0], [0, 0, 1, 0], [], []>} : vector<256x17xf32>, vector<256x17xf32>, vector<256x256xf32> -> vector<256x256xf32>
    %c0_3 = arith.constant 0 : index
    %c0_4 = arith.constant 0 : index
    %3 = vector.load %arg3[%c0_3, %c0_4] : memref<256x1xf32, #tpu.memory_space<vmem>>, vector<256x1xf32>
    %4 = vector.broadcast %3 : vector<256x1xf32> to vector<256x256xf32>
    %5 = arith.addf %2, %4 : vector<256x256xf32>
    %cst_5 = arith.constant 0.000000e+00 : f32
    %6 = vector.broadcast %cst_5 : f32 to vector<256x256xf32>
    %7 = arith.maximumf %5, %6 : vector<256x256xf32>
    %c0_6 = arith.constant 0 : index
    %c0_7 = arith.constant 0 : index
    %8 = vector.load %arg4[%c0_6, %c0_7] : memref<256x256xf32, #tpu.memory_space<vmem>>, vector<256x256xf32>
    %cst_8 = arith.constant dense<0.000000e+00> : vector<256x256xf32>
    %9 = tpu.matmul %8, %7, %cst_8 {dimension_numbers = #tpu.dot_dimension_numbers<[1], [0], [0], [1], [0, 0, 1, 1], [], []>} : vector<256x256xf32>, vector<256x256xf32>, vector<256x256xf32> -> vector<256x256xf32>
    %c0_9 = arith.constant 0 : index
    %c0_10 = arith.constant 0 : index
    %10 = vector.load %arg5[%c0_9, %c0_10] : memref<256x1xf32, #tpu.memory_space<vmem>>, vector<256x1xf32>
    %11 = vector.broadcast %10 : vector<256x1xf32> to vector<256x256xf32>
    %12 = arith.addf %9, %11 : vector<256x256xf32>
    %cst_11 = arith.constant 0.000000e+00 : f32
    %13 = vector.broadcast %cst_11 : f32 to vector<256x256xf32>
    %14 = arith.maximumf %12, %13 : vector<256x256xf32>
    %c0_12 = arith.constant 0 : index
    %c0_13 = arith.constant 0 : index
    %15 = vector.load %arg6[%c0_12, %c0_13] : memref<256x1xf32, #tpu.memory_space<vmem>>, vector<256x1xf32>
    %16 = vector.broadcast %15 : vector<256x1xf32> to vector<256x256xf32>
    %17 = arith.mulf %14, %16 : vector<256x256xf32>
    %cst_14 = arith.constant dense<0.000000e+00> : vector<256xf32>
    %18 = vector.multi_reduction <add>, %17, %cst_14 [0] : vector<256x256xf32> to vector<256xf32>
    %19 = vector.shape_cast %18 : vector<256xf32> to vector<1x256xf32>
    %c0_15 = arith.constant 0 : index
    %c0_16 = arith.constant 0 : index
    %20 = vector.load %arg7[%c0_15, %c0_16] : memref<1x1xf32, #tpu.memory_space<vmem>>, vector<1x1xf32>
    %21 = vector.broadcast %20 : vector<1x1xf32> to vector<1x256xf32>
    %22 = arith.addf %19, %21 : vector<1x256xf32>
    %c0_17 = arith.constant 0 : index
    %c0_18 = arith.constant 0 : index
    %23 = vector.load %arg8[%c0_17, %c0_18] : memref<1x256xf32, #tpu.memory_space<vmem>>, vector<1x256xf32>
    tpu.vector_store %arg8[%c0_17, %c0_18], %22 {strides = array<i32>} : memref<1x256xf32, #tpu.memory_space<vmem>>, vector<1x256xf32>,
    return
  }
  func.func @transform_0(%arg0: i32) -> (i32, i32) {
    %c0_i32 = arith.constant 0 : i32
    %c0_i32_0 = arith.constant 0 : i32
    return %arg0, %c0_i32 : i32, i32
  }
  func.func @transform_1(%arg0: i32) -> (i32, i32) {
    %c0_i32 = arith.constant 0 : i32
    %c0_i32_0 = arith.constant 0 : i32
    %c0_i32_1 = arith.constant 0 : i32
    return %c0_i32, %c0_i32_0 : i32, i32
  }
  func.func @transform_2(%arg0: i32) -> (i32, i32) {
    %c0_i32 = arith.constant 0 : i32
    %c0_i32_0 = arith.constant 0 : i32
    %c0_i32_1 = arith.constant 0 : i32
    return %c0_i32, %c0_i32_0 : i32, i32
  }
  func.func @transform_3(%arg0: i32) -> (i32, i32) {
    %c0_i32 = arith.constant 0 : i32
    %c0_i32_0 = arith.constant 0 : i32
    %c0_i32_1 = arith.constant 0 : i32
    return %c0_i32, %c0_i32_0 : i32, i32
  }
  func.func @transform_4(%arg0: i32) -> (i32, i32) {
    %c0_i32 = arith.constant 0 : i32
    %c0_i32_0 = arith.constant 0 : i32
    %c0_i32_1 = arith.constant 0 : i32
    return %c0_i32, %c0_i32_0 : i32, i32
  }
  func.func @transform_5(%arg0: i32) -> (i32, i32) {
    %c0_i32 = arith.constant 0 : i32
    %c0_i32_0 = arith.constant 0 : i32
    %c0_i32_1 = arith.constant 0 : i32
    return %c0_i32, %c0_i32_0 : i32, i32
  }
  func.func @transform_6(%arg0: i32) -> (i32, i32) {
    %c0_i32 = arith.constant 0 : i32
    %c0_i32_0 = arith.constant 0 : i32
    %c0_i32_1 = arith.constant 0 : i32
    return %c0_i32, %c0_i32_0 : i32, i32
  }
  func.func @transform_7(%arg0: i32) -> (i32, i32) {
    %c0_i32 = arith.constant 0 : i32
    %c0_i32_0 = arith.constant 0 : i32
    return %c0_i32, %arg0 : i32, i32
  }
}

</mosaic_0001>

<bundles_post_ra>
// kernel: fcn_forward.1
= control target key start
LH: loop header
LB: loop body
LE: loop exit
PB: predicated region body
PF: predicated region fallthrough
CT: control target
= control target key end

     0   :  { %s2395_s26 = smov 0   ;;  %s4048_s0 = inlined_call_operand.vmem [shape: f32[512,17], index: 0, kind: input, shape index: {}]   ;;  %s4049_s1 = inlined_call_operand.vmem [shape: f32[256,17], index: 1, kind: input, shape index: {}]   ;;  %s4050_s2 = inlined_call_operand.vmem [shape: f32[256,1], index: 2, kind: input, shape index: {}]   ;;  %s4051_s3 = inlined_call_operand.vmem [shape: f32[256,256], index: 3, kind: input, shape index: {}]   ;;  %s4052_s4 = inlined_call_operand.vmem [shape: f32[256,1], index: 4, kind: input, shape index: {}]   ;;  %s4053_s5 = inlined_call_operand.vmem [shape: f32[256,1], index: 5, kind: input, shape index: {}]   ;;  %s4054_s6 = inlined_call_operand.<no memory space> [shape: f32[1,1], index: 6, kind: input, shape index: {}]   ;;  %s4055_s7 = inlined_call_operand.vmem [shape: f32[1,512], index: 7, kind: output, shape index: {}]  }
   0x1   :  { %v12_v0 = vstv %s4054_s6 }
   0x2   :  { %13 = vst [vmem:[#allocation2] sm:$0x1] %v12_v0 }
   0x3 LB: > { %s2193_s27 = sadd.s32 4294967295, %s2349_s26   ;;  %p2197_p0 = scmp.ge.s32.totalorder %s2349_s26, 1  ;;  %s2349_s26 = sphi %s2395_s26, %s19_s26  }
   0x4   : > { %p240_p1 = scmp.lt.s32.totalorder %s2349_s26, 3 }
   0x6   : > { %p241_p2 = pnand %p2197_p0, %p240_p1 }
   0x8   : > { %244 = sbr.rel (%p241_p2) target bundleno = 1043 (0x413), region = 48 }
   0xd   : > { %s2198_s28 = sshll.u32 %s2193_s27, 5  ;;  %v361_v1 = vld [vmem:[%s4050_s2 + $0x78] sm:$0xff]  ;;  %v2351_v3 = vmov 0   ;;  %v376_v4 = vld [vmem:[%s4050_s2 + $0xf0] sm:$0xff]  ;;  %vm538_vm0 = vcmask 138240   ;;  %v359_v8 = vld [vmem:[%s4050_s2 + $0x68] sm:$0xff] }
   0xe   : > { %v377_v2 = vld [vmem:[%s4050_s2 + $0xf8] sm:$0xff]  ;;  %p272_p3 = scmp.lt.s32.totalorder %s2198_s28, 63  ;;  %2340 = vset.pattern.permute.xlu0 %v2351_v3  ;;  %2341 = vset.pattern.permute.xlu1 %v2351_v3  ;;  %v360_v5 = vld [vmem:[%s4050_s2 + $0x70] sm:$0xff]  ;;  %v358_v13 = vld [vmem:[%s4050_s2 + $0x60] sm:$0xff]  ;;  %s2200_s21 = sshll.u32 %s2193_s27, 1  ;;  %vm2135_vm1 = vcmask 1040384  }
   0xf   : > { %455 = vperm.xlu0 %2340, %v361_v1   ;;  %535 = vperm.xlu1 %2341, %v377_v2   ;;  %v375_v14 = vld [vmem:[%s4050_s2 + $0xe8] sm:$0xff]  ;;  %v357_v15 = vld [vmem:[%s4050_s2 + $0x58] sm:$0xff]  ;;  %v374_v18 = vld [vmem:[%s4050_s2 + $0xe0] sm:$0xff]  ;;  %p278_p4 = scmp.lt.s32.totalorder %s2200_s21, 3 }
  0x10   : > { %s4287_s28 = smov (!%p272_p3, %s2198_s28), 63  ;;  %2342 = vset.pattern.permute.xlu2 %v2351_v3  ;;  %v356_v21 = vld [vmem:[%s4050_s2 + $0x50] sm:$0xff]  ;;  %v373_v22 = vld [vmem:[%s4050_s2 + $0xd8] sm:$0xff]  ;;  %v355_v25 = vld [vmem:[%s4050_s2 + $0x48] sm:$0xff] }
  0x11   : > { %530 = vperm.xlu2 %2342, %v376_v4   ;;  %s2199_s11 = sshll.u32 %s4287_s28, 3  ;;  %v372_v28 = vld [vmem:[%s4050_s2 + $0xd0] sm:$0xff]  ;;  %v354_v29 = vld [vmem:[%s4050_s2 + $0x40] sm:$0xff]  ;;  %v371_v32 = vld [vmem:[%s4050_s2 + $0xc8] sm:$0xff]  ;;  %s4289_s21 = smov (!%p278_p4, %s2200_s21), 3 }
  0x12   : > { %s2417_s14 = scalar_lea.vmem %s4048_s0, %s2199_s11  ;;  %v353_v35 = vld [vmem:[%s4050_s2 + $0x38] sm:$0xff]  ;;  %v370_v36 = vld [vmem:[%s4050_s2 + $0xc0] sm:$0xff]  ;;  %v352_v39 = vld [vmem:[%s4050_s2 + $0x30] sm:$0xff]  ;;  %s280_s23 = scalar_lea.vmem %s4055_s7, %s4289_s21 }
  0x13   : > { %v297_v6 = vld [vmem:[%s2417_s14 + $0x78] sm:$0xff]  ;;  %v296_v9 = vld [vmem:[%s2417_s14 + $0x70] sm:$0xff]  ;;  %v295_v11 = vld [vmem:[%s2417_s14 + $0x68] sm:$0xff] }
  0x14   : > { %v313_v7 = vld [vmem:[%s2417_s14 + $0xf8] sm:$0xff]  ;;  %2201 = vmatpush.xpose.msk.msra.mxu0 %vm538_vm0, %v297_v6  ;;  %v312_v10 = vld [vmem:[%s2417_s14 + $0xf0] sm:$0xff]  ;;  %v311_v12 = vld [vmem:[%s2417_s14 + $0xe8] sm:$0xff] }
  0x15   : > { %2249 = vmatpush.xpose.msk.msra.mxu1 %vm538_vm0, %v313_v7  ;;  %v294_v16 = vld [vmem:[%s2417_s14 + $0x60] sm:$0xff]  ;;  %v293_v19 = vld [vmem:[%s2417_s14 + $0x58] sm:$0xff]  ;;  %v292_v23 = vld [vmem:[%s2417_s14 + $0x50] sm:$0xff] }
  0x16   : > { %v310_v17 = vld [vmem:[%s2417_s14 + $0xe0] sm:$0xff]  ;;  %v309_v20 = vld [vmem:[%s2417_s14 + $0xd8] sm:$0xff]  ;;  %v308_v24 = vld [vmem:[%s2417_s14 + $0xd0] sm:$0xff] }
  0x17   : > { %450 = vperm.xlu0 %2340, %v360_v5   ;;  %445 = vperm.xlu1 %2341, %v359_v8   ;;  %v291_v26 = vld [vmem:[%s2417_s14 + $0x48] sm:$0xff]  ;;  %v290_v30 = vld [vmem:[%s2417_s14 + $0x40] sm:$0xff]  ;;  %v289_v33 = vld [vmem:[%s2417_s14 + $0x38] sm:$0xff] }
  0x18   : > { %2202 = vmatpush.xpose.msk.msra.mxu0 %vm538_vm0, %v296_v9  ;;  %v307_v27 = vld [vmem:[%s2417_s14 + $0xc8] sm:$0xff]  ;;  %v306_v31 = vld [vmem:[%s2417_s14 + $0xc0] sm:$0xff]  ;;  %v305_v34 = vld [vmem:[%s2417_s14 + $0xb8] sm:$0xff] }
  0x19   : > { %2250 = vmatpush.xpose.msk.msra.mxu1 %vm538_vm0, %v312_v10  ;;  %440 = vperm.xlu2 %2342, %v358_v13   ;;  %v288_v37 = vld [vmem:[%s2417_s14 + $0x30] sm:$0xff]  ;;  %v287_v40 = vld [vmem:[%s2417_s14 + $0x28] sm:$0xff]  ;;  %v369_v42 = vld [vmem:[%s4050_s2 + $0xb8] sm:$0xff] }
  0x1a   : > { %v304_v38 = vld [vmem:[%s2417_s14 + $0xb0] sm:$0xff]  ;;  %v303_v41 = vld [vmem:[%s2417_s14 + $0xa8] sm:$0xff]  ;;  %v286_v44 = vld [vmem:[%s2417_s14 + $0x20] sm:$0xff] }
  0x1b   : > { %v351_v43 = vld [vmem:[%s4050_s2 + $0x28] sm:$0xff]  ;;  %v302_v45 = vld [vmem:[%s2417_s14 + $0xa0] sm:$0xff]  ;;  %v368_v46 = vld [vmem:[%s4050_s2 + $0xb0] sm:$0xff] }
  0x1c   : > { %2203 = vmatpush.xpose.msk.msra.mxu0 %vm538_vm0, %v295_v11  ;;  %v285_v47 = vld [vmem:[%s2417_s14 + $0x18] sm:$0xff]  ;;  %v350_v49 = vld [vmem:[%s4050_s2 + $0x20] sm:$0xff]  ;;  %v367_v50 = vld [vmem:[%s4050_s2 + $0xa8] sm:$0xff] }
  0x1d   : > { %2251 = vmatpush.xpose.msk.msra.mxu1 %vm538_vm0, %v311_v12  ;;  %v301_v48 = vld [vmem:[%s2417_s14 + $0x98] sm:$0xff]  ;;  %v284_v51 = vld [vmem:[%s2417_s14 + $0x10] sm:$0xff]  ;;  %v283_v54 = vld [vmem:[%s2417_s14 + $0x8] sm:$0xff] }
  0x1e   : > { %v300_v52 = vld [vmem:[%s2417_s14 + $0x90] sm:$0xff]  ;;  %v349_v53 = vld [vmem:[%s4050_s2 + $0x18] sm:$0xff]  ;;  %v299_v55 = vld [vmem:[%s2417_s14 + $0x88] sm:$0xff] }
  0x1f   : > { %525 = vperm.xlu0 %2340, %v375_v14   ;;  %435 = vperm.xlu1 %2341, %v357_v15   ;;  %v366_v56 = vld [vmem:[%s4050_s2 + $0xa0] sm:$0xff]  ;;  %v348_v57 = vld [vmem:[%s4050_s2 + $0x10] sm:$0xff]  ;;  %v365_v60 = vld [vmem:[%s4050_s2 + $0x98] sm:$0xff] }
  0x20   : > { %2204 = vmatpush.xpose.msk.msra.mxu0 %vm538_vm0, %v294_v16  ;;  %v282_v58 = vld [vmem:[%s2417_s14] sm:$0xff]  ;;  %v347_v62 = vld [vmem:[%s4050_s2 + $0x8] sm:$0xff]  ;;  %v364_v63 = vld [vmem:[%s4050_s2 + $0x90] sm:$0xff] }
  0x21   : > { %2252 = vmatpush.xpose.msk.msra.mxu1 %vm538_vm0, %v310_v17  ;;  %520 = vperm.xlu2 %2342, %v374_v18   ;;  %v298_v59 = vld [vmem:[%s2417_s14 + $0x80] sm:$0xff]  ;;  %v315_v1 = vld [vmem:[%s4049_s1 + $0x8] sm:$0xff]  ;;  %v316_v4 = vld [vmem:[%s4049_s1 + $0x10] sm:$0xff] }
  0x22   : > { %v314_v61 = vld [vmem:[%s4049_s1] sm:$0xff]  ;;  %v363_v2 = vld [vmem:[%s4050_s2 + $0x88] sm:$0xff]  ;;  %v1087_v6 = vld [vmem:[%s4052_s4 + $0x10] sm:$0xff] }
  0x23   : > { %v346_v0 = vld [vmem:[%s4050_s2] sm:$0xff]  ;;  %v1086_v5 = vld [vmem:[%s4052_s4 + $0x8] sm:$0xff]  ;;  %v317_v7 = vld [vmem:[%s4049_s1 + $0x18] sm:$0xff] }
  0x24   : > { %2205 = vmatpush.xpose.msk.msra.mxu0 %vm538_vm0, %v293_v19  ;;  %v362_v3 = vld [vmem:[%s4050_s2 + $0x80] sm:$0xff]  ;;  %v1090_v9 = vld [vmem:[%s4052_s4 + $0x28] sm:$0xff]  ;;  %v1092_v11 = vld [vmem:[%s4052_s4 + $0x38] sm:$0xff] }
  0x25   : > { %2253 = vmatpush.xpose.msk.msra.mxu1 %vm538_vm0, %v309_v20  ;;  %v1089_v8 = vld [vmem:[%s4052_s4 + $0x20] sm:$0xff]  ;;  %v319_v14 = vld [vmem:[%s4049_s1 + $0x28] sm:$0xff]  ;;  %v1095_v15 = vld [vmem:[%s4052_s4 + $0x50] sm:$0xff] }
  0x26   : > { %v318_v10 = vld [vmem:[%s4049_s1 + $0x20] sm:$0xff]  ;;  %v1096_v16 = vld [vmem:[%s4052_s4 + $0x58] sm:$0xff]  ;;  %v320_v18 = vld [vmem:[%s4049_s1 + $0x30] sm:$0xff] }
  0x27   : > { %430 = vperm.xlu0 %2340, %v356_v21   ;;  %515 = vperm.xlu1 %2341, %v373_v22   ;;  %v1093_v12 = vld [vmem:[%s4052_s4 + $0x40] sm:$0xff]  ;;  %v1088_v17 = vld [vmem:[%s4052_s4 + $0x18] sm:$0xff]  ;;  %v1098_v19 = vld [vmem:[%s4052_s4 + $0x68] sm:$0xff] }
  0x28   : > { %2206 = vmatpush.xpose.msk.msra.mxu0 %vm538_vm0, %v292_v23  ;;  %v1085_v13 = vld [vmem:[%s4052_s4] sm:$0xff]  ;;  %v1099_v20 = vld [vmem:[%s4052_s4 + $0x70] sm:$0xff]  ;;  %v321_v22 = vld [vmem:[%s4049_s1 + $0x38] sm:$0xff] }
  0x29   : > { %2254 = vmatpush.xpose.msk.msra.mxu1 %vm538_vm0, %v308_v24  ;;  %425 = vperm.xlu2 %2342, %v355_v25   ;;  %v1091_v21 = vld [vmem:[%s4052_s4 + $0x30] sm:$0xff]  ;;  %v1101_v23 = vld [vmem:[%s4052_s4 + $0x80] sm:$0xff]  ;;  %v1102_v24 = vld [vmem:[%s4052_s4 + $0x88] sm:$0xff] }
  0x2a   : > { %v1094_v25 = vld [vmem:[%s4052_s4 + $0x48] sm:$0xff] }
  0x2c   : > { %2207 = vmatpush.xpose.msk.msra.mxu0 %vm538_vm0, %v291_v26  ;;  %v322_v26 = vld [vmem:[%s4049_s1 + $0x40] sm:$0xff] }
  0x2d   : > { %2255 = vmatpush.xpose.msk.msra.mxu1 %vm538_vm0, %v307_v27  ;;  %v1104_v27 = vld [vmem:[%s4052_s4 + $0x98] sm:$0xff] }
  0x2f   : > { %510 = vperm.xlu0 %2340, %v372_v28   ;;  %420 = vperm.xlu1 %2341, %v354_v29   ;;  %v1105_v28 = vld [vmem:[%s4052_s4 + $0xa0] sm:$0xff] }
  0x30   : > { %2208 = vmatpush.xpose.msk.msra.mxu0 %vm538_vm0, %v290_v30  ;;  %v1097_v29 = vld [vmem:[%s4052_s4 + $0x60] sm:$0xff]  ;;  %v323_v30 = vld [vmem:[%s4049_s1 + $0x48] sm:$0xff] }
  0x31   : > { %2256 = vmatpush.xpose.msk.msra.mxu1 %vm538_vm0, %v306_v31  ;;  %505 = vperm.xlu2 %2342, %v371_v32   ;;  %v1107_v31 = vld [vmem:[%s4052_s4 + $0xb0] sm:$0xff]  ;;  %v1108_v32 = vld [vmem:[%s4052_s4 + $0xb8] sm:$0xff] }
  0x34   : > { %2209 = vmatpush.xpose.msk.msra.mxu0 %vm538_vm0, %v289_v33  ;;  %v1100_v33 = vld [vmem:[%s4052_s4 + $0x78] sm:$0xff] }
  0x35   : > { %2257 = vmatpush.xpose.msk.msra.mxu1 %vm538_vm0, %v305_v34  ;;  %v324_v34 = vld [vmem:[%s4049_s1 + $0x50] sm:$0xff] }
  0x37   : > { %415 = vperm.xlu0 %2340, %v353_v35   ;;  %500 = vperm.xlu1 %2341, %v370_v36   ;;  %v1110_v35 = vld [vmem:[%s4052_s4 + $0xc8] sm:$0xff]  ;;  %v1111_v36 = vld [vmem:[%s4052_s4 + $0xd0] sm:$0xff] }
  0x38   : > { %2210 = vmatpush.xpose.msk.msra.mxu0 %vm538_vm0, %v288_v37  ;;  %v1103_v37 = vld [vmem:[%s4052_s4 + $0x90] sm:$0xff] }
  0x39   : > { %2258 = vmatpush.xpose.msk.msra.mxu1 %vm538_vm0, %v304_v38  ;;  %410 = vperm.xlu2 %2342, %v352_v39   ;;  %v325_v38 = vld [vmem:[%s4049_s1 + $0x58] sm:$0xff]  ;;  %v1113_v39 = vld [vmem:[%s4052_s4 + $0xe0] sm:$0xff] }
  0x3c   : > { %2211 = vmatpush.xpose.msk.msra.mxu0 %vm538_vm0, %v287_v40  ;;  %v1114_v40 = vld [vmem:[%s4052_s4 + $0xe8] sm:$0xff] }
  0x3d   : > { %2259 = vmatpush.xpose.msk.msra.mxu1 %vm538_vm0, %v303_v41  ;;  %v326_v41 = vld [vmem:[%s4049_s1 + $0x60] sm:$0xff] }
  0x3f   : > { %495 = vperm.xlu0 %2340, %v369_v42   ;;  %405 = vperm.xlu1 %2341, %v351_v43   ;;  %v1106_v42 = vld [vmem:[%s4052_s4 + $0xa8] sm:$0xff]  ;;  %v1116_v43 = vld [vmem:[%s4052_s4 + $0xf8] sm:$0xff] }
  0x40   : > { %2212 = vmatpush.xpose.msk.msra.mxu0 %vm538_vm0, %v286_v44  ;;  %v1793_v44 = vld [vmem:[%s4053_s5] sm:$0xff] }
  0x41   : > { %2260 = vmatpush.xpose.msk.msra.mxu1 %vm538_vm0, %v302_v45  ;;  %490 = vperm.xlu2 %2342, %v368_v46   ;;  %v327_v45 = vld [vmem:[%s4049_s1 + $0x68] sm:$0xff]  ;;  %v1109_v46 = vld [vmem:[%s4052_s4 + $0xc0] sm:$0xff] }
  0x44   : > { %2213 = vmatpush.xpose.msk.msra.mxu0 %vm538_vm0, %v285_v47  ;;  %v1795_v47 = vld [vmem:[%s4053_s5 + $0x10] sm:$0xff] }
  0x45   : > { %2261 = vmatpush.xpose.msk.msra.mxu1 %vm538_vm0, %v301_v48  ;;  %v1796_v48 = vld [vmem:[%s4053_s5 + $0x18] sm:$0xff] }
  0x47   : > { %400 = vperm.xlu0 %2340, %v350_v49   ;;  %485 = vperm.xlu1 %2341, %v367_v50   ;;  %v328_v49 = vld [vmem:[%s4049_s1 + $0x70] sm:$0xff]  ;;  %v1112_v50 = vld [vmem:[%s4052_s4 + $0xd8] sm:$0xff] }
  0x48   : > { %2214 = vmatpush.xpose.msk.msra.mxu0 %vm538_vm0, %v284_v51  ;;  %v1798_v51 = vld [vmem:[%s4053_s5 + $0x28] sm:$0xff] }
  0x49   : > { %2262 = vmatpush.xpose.msk.msra.mxu1 %vm538_vm0, %v300_v52  ;;  %395 = vperm.xlu2 %2342, %v349_v53   ;;  %v1799_v52 = vld [vmem:[%s4053_s5 + $0x30] sm:$0xff]  ;;  %v329_v53 = vld [vmem:[%s4049_s1 + $0x78] sm:$0xff] }
  0x4c   : > { %2215 = vmatpush.xpose.msk.msra.mxu0 %vm538_vm0, %v283_v54  ;;  %v1115_v54 = vld [vmem:[%s4052_s4 + $0xf0] sm:$0xff] }
  0x4d   : > { %2263 = vmatpush.xpose.msk.msra.mxu1 %vm538_vm0, %v299_v55  ;;  %v1801_v55 = vld [vmem:[%s4053_s5 + $0x40] sm:$0xff] }
  0x4f   : > { %480 = vperm.xlu0 %2340, %v366_v56   ;;  %390 = vperm.xlu1 %2341, %v348_v57   ;;  %v1802_v56 = vld [vmem:[%s4053_s5 + $0x48] sm:$0xff] }
  0x50   : > { %2216 = vmatpush.xpose.msk.msra.mxu0 %vm538_vm0, %v282_v58 }
  0x51   : > { %2264 = vmatpush.xpose.msk.msra.mxu1 %vm538_vm0, %v298_v59  ;;  %475 = vperm.xlu2 %2342, %v365_v60   ;;  %v330_v59 = vld [vmem:[%s4049_s1 + $0x80] sm:$0xff]  ;;  %v1794_v60 = vld [vmem:[%s4053_s5 + $0x8] sm:$0xff] }
  0x53   : > { %2217 = vmatmul.msk.f32.vlgmr.msra.gmra.mxu0 %vm538_vm0, %v314_v61 }
  0x54   : > { %2265 = vmatmul.msk.f32.vlgmr.msra.gmra.mxu1 %vm538_vm0, %v314_v61  ;;  %v1804_v61 = vld [vmem:[%s4053_s5 + $0x58] sm:$0xff] }
  0x57   : > { %385 = vperm.xlu0 %2340, %v347_v62   ;;  %470 = vperm.xlu1 %2341, %v364_v63   ;;  %v1805_v62 = vld [vmem:[%s4053_s5 + $0x60] sm:$0xff] }
  0x59   : > { %380 = vperm.xlu2 %2342, %v346_v0  }
  0x5b   : > { %2218 = vmatmul.msk.f32.gmra.mxu0 %vm538_vm0, %v315_v1 }
  0x5c   : > { %2266 = vmatmul.msk.f32.gmra.mxu1 %vm538_vm0, %v315_v1  ;;  %v331_v1 = vld [vmem:[%s4049_s1 + $0x88] sm:$0xff] }
  0x5f   : > { %465 = vperm.xlu0 %2340, %v363_v2   ;;  %460 = vperm.xlu1 %2341, %v362_v3   ;;  %v1797_v2 = vld [vmem:[%s4053_s5 + $0x20] sm:$0xff]  ;;  %v1807_v3 = vld [vmem:[%s4053_s5 + $0x70] sm:$0xff] }
  0x61   : > { %1119 = vperm.xlu2 %2342, %v1085_v13   ;;  %v333_v13 = vld [vmem:[%s4049_s1 + $0x98] sm:$0xff] }
  0x63   : > { %2219 = vmatmul.msk.f32.gmra.mxu0 %vm538_vm0, %v316_v4 }
  0x64   : > { %2267 = vmatmul.msk.f32.gmra.mxu1 %vm538_vm0, %v316_v4  ;;  %v1808_v4 = vld [vmem:[%s4053_s5 + $0x78] sm:$0xff] }
  0x67   : > { %1124 = vperm.xlu0 %2340, %v1086_v5   ;;  %1129 = vperm.xlu1 %2341, %v1087_v6  }
  0x69   : > { %1134 = vperm.xlu2 %2342, %v1088_v17  }
  0x6b   : > { %2220 = vmatmul.msk.f32.gmra.mxu0 %vm538_vm0, %v317_v7 }
  0x6c   : > { %2268 = vmatmul.msk.f32.gmra.mxu1 %vm538_vm0, %v317_v7  ;;  %v332_v7 = vld [vmem:[%s4049_s1 + $0x90] sm:$0xff] }
  0x6f   : > { %1139 = vperm.xlu0 %2340, %v1089_v8   ;;  %1144 = vperm.xlu1 %2341, %v1090_v9   ;;  %v1800_v8 = vld [vmem:[%s4053_s5 + $0x38] sm:$0xff]  ;;  %v1810_v9 = vld [vmem:[%s4053_s5 + $0x88] sm:$0xff] }
  0x71   : > { %1149 = vperm.xlu2 %2342, %v1091_v21   ;;  %v1816_v21 = vld [vmem:[%s4053_s5 + $0xb8] sm:$0xff] }
  0x73   : > { %2221 = vmatmul.msk.f32.gmra.mxu0 %vm538_vm0, %v318_v10 }
  0x74   : > { %2269 = vmatmul.msk.f32.gmra.mxu1 %vm538_vm0, %v318_v10  ;;  %v1811_v10 = vld [vmem:[%s4053_s5 + $0x90] sm:$0xff] }
  0x77   : > { %1154 = vperm.xlu0 %2340, %v1092_v11   ;;  %1159 = vperm.xlu1 %2341, %v1093_v12  }
  0x79   : > { %1164 = vperm.xlu2 %2342, %v1094_v25   ;;  %v335_v25 = vld [vmem:[%s4049_s1 + $0xa8] sm:$0xff] }
  0x7b   : > { %2222 = vmatmul.msk.f32.gmra.mxu0 %vm538_vm0, %v319_v14 }
  0x7c   : > { %2270 = vmatmul.msk.f32.gmra.mxu1 %vm538_vm0, %v319_v14  ;;  %v1803_v14 = vld [vmem:[%s4053_s5 + $0x50] sm:$0xff] }
  0x7f   : > { %1169 = vperm.xlu0 %2340, %v1095_v15   ;;  %1174 = vperm.xlu1 %2341, %v1096_v16   ;;  %v1813_v15 = vld [vmem:[%s4053_s5 + $0xa0] sm:$0xff]  ;;  %v1814_v16 = vld [vmem:[%s4053_s5 + $0xa8] sm:$0xff] }
  0x81   : > { %1179 = vperm.xlu2 %2342, %v1097_v29  }
  0x83   : > { %2223 = vmatmul.msk.f32.gmra.mxu0 %vm538_vm0, %v320_v18 }
  0x84   : > { %2271 = vmatmul.msk.f32.gmra.mxu1 %vm538_vm0, %v320_v18 }
  0x87   : > { %1184 = vperm.xlu0 %2340, %v1098_v19   ;;  %1189 = vperm.xlu1 %2341, %v1099_v20   ;;  %v334_v19 = vld [vmem:[%s4049_s1 + $0xa0] sm:$0xff]  ;;  %v1806_v20 = vld [vmem:[%s4053_s5 + $0x68] sm:$0xff] }
  0x89   : > { %1194 = vperm.xlu2 %2342, %v1100_v33   ;;  %v1822_v33 = vld [vmem:[%s4053_s5 + $0xe8] sm:$0xff] }
  0x8b   : > { %2224 = vmatmul.msk.f32.gmra.mxu0 %vm538_vm0, %v321_v22 }
  0x8c   : > { %2272 = vmatmul.msk.f32.gmra.mxu1 %vm538_vm0, %v321_v22  ;;  %v1817_v22 = vld [vmem:[%s4053_s5 + $0xc0] sm:$0xff] }
  0x8f   : > { %1199 = vperm.xlu0 %2340, %v1101_v23   ;;  %1204 = vperm.xlu1 %2341, %v1102_v24  }
  0x91   : > { %1209 = vperm.xlu2 %2342, %v1103_v37  }
  0x93   : > { %2225 = vmatmul.msk.f32.gmra.mxu0 %vm538_vm0, %v322_v26 }
  0x94   : > { %2273 = vmatmul.msk.f32.gmra.mxu1 %vm538_vm0, %v322_v26  ;;  %v1809_v26 = vld [vmem:[%s4053_s5 + $0x80] sm:$0xff] }
  0x97   : > { %1214 = vperm.xlu0 %2340, %v1104_v27   ;;  %1219 = vperm.xlu1 %2341, %v1105_v28   ;;  %v1819_v27 = vld [vmem:[%s4053_s5 + $0xd0] sm:$0xff]  ;;  %v1820_v28 = vld [vmem:[%s4053_s5 + $0xd8] sm:$0xff] }
  0x99   : > { %1224 = vperm.xlu2 %2342, %v1106_v42  }
  0x9b   : > { %2226 = vmatmul.msk.f32.gmra.mxu0 %vm538_vm0, %v323_v30 }
  0x9c   : > { %2274 = vmatmul.msk.f32.gmra.mxu1 %vm538_vm0, %v323_v30 }
  0x9f   : > { %1229 = vperm.xlu0 %2340, %v1107_v31   ;;  %1234 = vperm.xlu1 %2341, %v1108_v32   ;;  %v336_v31 = vld [vmem:[%s4049_s1 + $0xb0] sm:$0xff]  ;;  %v1812_v32 = vld [vmem:[%s4053_s5 + $0x98] sm:$0xff] }
  0xa1   : > { %1239 = vperm.xlu2 %2342, %v1109_v46   ;;  %v338_v46 = vld [vmem:[%s4049_s1 + $0xc0] sm:$0xff] }
  0xa3   : > { %2227 = vmatmul.msk.f32.gmra.mxu0 %vm538_vm0, %v324_v34 }
  0xa4   : > { %2275 = vmatmul.msk.f32.gmra.mxu1 %vm538_vm0, %v324_v34  ;;  %v1823_v34 = vld [vmem:[%s4053_s5 + $0xf0] sm:$0xff] }
  0xa7   : > { %1244 = vperm.xlu0 %2340, %v1110_v35   ;;  %1249 = vperm.xlu1 %2341, %v1111_v36   ;;  %v2893_v35 = vpop.permute.xlu0 %455  ;;  %v2895_v36 = vpop.permute.xlu2 %530 }
  0xa9   : > { %1254 = vperm.xlu2 %2342, %v1112_v50  }
  0xab   : > { %2228 = vmatmul.msk.f32.gmra.mxu0 %vm538_vm0, %v325_v38 }
  0xac   : > { %2276 = vmatmul.msk.f32.gmra.mxu1 %vm538_vm0, %v325_v38 }
  0xaf   : > { %1259 = vperm.xlu0 %2340, %v1113_v39   ;;  %1264 = vperm.xlu1 %2341, %v1114_v40   ;;  %v337_v39 = vld [vmem:[%s4049_s1 + $0xb8] sm:$0xff]  ;;  %v1815_v40 = vld [vmem:[%s4053_s5 + $0xb0] sm:$0xff]  ;;  %v2909_v42 = vpop.permute.xlu0 %450 }
  0xb1   : > { %1269 = vperm.xlu2 %2342, %v1115_v54   ;;  %v1821_v54 = vld [vmem:[%s4053_s5 + $0xe0] sm:$0xff] }
  0xb3   : > { %2229 = vmatmul.msk.f32.gmra.mxu0 %vm538_vm0, %v326_v41 }
  0xb4   : > { %2277 = vmatmul.msk.f32.gmra.mxu1 %vm538_vm0, %v326_v41  ;;  %v2123_v41 = vld [vmem:[#allocation2] sm:$0x1] }
  0xb7   : > { %1274 = vperm.xlu0 %2340, %v1116_v43   ;;  %1827 = vperm.xlu1 %2341, %v1793_v44   ;;  %v2911_v43 = vpop.permute.xlu1 %535 }
  0xb9   : > { %1832 = vperm.xlu2 %2342, %v1794_v60   ;;  %v340_v60 = vld [vmem:[%s4049_s1 + $0xd0] sm:$0xff] }
  0xbb   : > { %2230 = vmatmul.msk.f32.gmra.mxu0 %vm538_vm0, %v327_v45 }
  0xbc   : > { %2278 = vmatmul.msk.f32.gmra.mxu1 %vm538_vm0, %v327_v45 }
  0xbf   : > { %1837 = vperm.xlu0 %2340, %v1795_v47   ;;  %1842 = vperm.xlu1 %2341, %v1796_v48   ;;  %v2920_v47 = vpop.permute.xlu2 %440  ;;  %v1818_v48 = vld [vmem:[%s4053_s5 + $0xc8] sm:$0xff] }
  0xc1   : > { %1847 = vperm.xlu2 %2342, %v1797_v2  }
  0xc3   : > { %2231 = vmatmul.msk.f32.gmra.mxu0 %vm538_vm0, %v328_v49 }
  0xc4   : > { %2279 = vmatmul.msk.f32.gmra.mxu1 %vm538_vm0, %v328_v49 }
  0xc7   : > { %1852 = vperm.xlu0 %2340, %v1798_v51   ;;  %1857 = vperm.xlu1 %2341, %v1799_v52   ;;  %v339_v51 = vld [vmem:[%s4049_s1 + $0xc8] sm:$0xff]  ;;  %v2934_v52 = vpop.permute.xlu0 %525 }
  0xc9   : > { %1862 = vperm.xlu2 %2342, %v1800_v8  }
  0xcb   : > { %2232 = vmatmul.msk.f32.gmra.mxu0 %vm538_vm0, %v329_v53 }
  0xcc   : > { %2280 = vmatmul.msk.f32.gmra.mxu1 %vm538_vm0, %v329_v53  ;;  %v2936_v53 = vpop.permute.xlu1 %445 }
  0xcf   : > { %1867 = vperm.xlu0 %2340, %v1801_v55   ;;  %1872 = vperm.xlu1 %2341, %v1802_v56   ;;  %v2941_v55 = vpop.permute.xlu2 %520 }
  0xd0   : > { %v2767_v57 = vpop.f32.mrf.mxu0 }
  0xd1   : > { %v2769_v58 = vpop.f32.mrf.mxu1  ;;  %1877 = vperm.xlu2 %2342, %v1803_v14  }
  0xd3   : > { %2233 = vmatmul.msk.f32.gmra.mxu0 %vm538_vm0, %v330_v59 }
  0xd4   : > { %2281 = vmatmul.msk.f32.gmra.mxu1 %vm538_vm0, %v330_v59 }
  0xd7   : > { %1882 = vperm.xlu0 %2340, %v1804_v61   ;;  %1887 = vperm.xlu1 %2341, %v1805_v62   ;;  %v1824_v61 = vld [vmem:[%s4053_s5 + $0xf8] sm:$0xff]  ;;  %v2953_v62 = vpop.permute.xlu0 %430  ;;  %v2959_v2 = vpop.permute.xlu2 %425 }
  0xd8   : > { %v2785_v63 = vpop.f32.mrf.mxu0 }
  0xd9   : > { %v2787_v0 = vpop.f32.mrf.mxu1  ;;  %1892 = vperm.xlu2 %2342, %v1806_v20  }
  0xdb   : > { %2234 = vmatmul.msk.f32.gmra.mxu0 %vm538_vm0, %v331_v1 }
  0xdc   : > { %2282 = vmatmul.msk.f32.gmra.mxu1 %vm538_vm0, %v331_v1  ;;  %v2955_v1 = vpop.permute.xlu1 %435 }
  0xdf   : > { %1897 = vperm.xlu0 %2340, %v1807_v3   ;;  %1902 = vperm.xlu1 %2341, %v1808_v4   ;;  %v2968_v8 = vpop.permute.xlu0 %510 }
  0xe0   : > { %v2803_v5 = vpop.f32.mrf.mxu0 }
  0xe1   : > { %v2805_v6 = vpop.f32.mrf.mxu1  ;;  %1907 = vperm.xlu2 %2342, %v1809_v26  }
  0xe3   : > { %2235 = vmatmul.msk.f32.gmra.mxu0 %vm538_vm0, %v332_v7 }
  0xe4   : > { %2283 = vmatmul.msk.f32.gmra.mxu1 %vm538_vm0, %v332_v7  ;;  %v341_v7 = vld [vmem:[%s4049_s1 + $0xd8] sm:$0xff] }
  0xe7   : > { %1912 = vperm.xlu0 %2340, %v1810_v9   ;;  %1917 = vperm.xlu1 %2341, %v1811_v10   ;;  %v2970_v9 = vpop.permute.xlu1 %515  ;;  %v2972_v10 = vpop.permute.xlu2 %505 }
  0xe8   : > { %v2821_v11 = vpop.f32.mrf.mxu0 }
  0xe9   : > { %v2823_v12 = vpop.f32.mrf.mxu1  ;;  %1922 = vperm.xlu2 %2342, %v1812_v32  }
  0xeb   : > { %2236 = vmatmul.msk.f32.gmra.mxu0 %vm538_vm0, %v333_v13 }
  0xec   : > { %2284 = vmatmul.msk.f32.gmra.mxu1 %vm538_vm0, %v333_v13 }
  0xef   : > { %1927 = vperm.xlu0 %2340, %v1813_v15   ;;  %1932 = vperm.xlu1 %2341, %v1814_v16   ;;  %v342_v15 = vld [vmem:[%s4049_s1 + $0xe0] sm:$0xff]  ;;  %v2981_v16 = vpop.permute.xlu0 %415 }
  0xf0   : > { %v2839_v17 = vpop.f32.mrf.mxu0 }
  0xf1   : > { %v2841_v18 = vpop.f32.mrf.mxu1  ;;  %1937 = vperm.xlu2 %2342, %v1815_v40   ;;  %v345_v40 = vld [vmem:[%s4049_s1 + $0xf8] sm:$0xff] }
  0xf3   : > { %2237 = vmatmul.msk.f32.gmra.mxu0 %vm538_vm0, %v334_v19 }
  0xf4   : > { %2285 = vmatmul.msk.f32.gmra.mxu1 %vm538_vm0, %v334_v19  ;;  %v2983_v19 = vpop.permute.xlu1 %420 }
  0xf7   : > { %1942 = vperm.xlu0 %2340, %v1816_v21   ;;  %1947 = vperm.xlu1 %2341, %v1817_v22   ;;  %v343_v22 = vld [vmem:[%s4049_s1 + $0xe8] sm:$0xff]  ;;  %v3001_v32 = vpop.permute.xlu0 %495 }
  0xf8   : > { %v2857_v23 = vpop.f32.mrf.mxu0 }
  0xf9   : > { %v2859_v24 = vpop.f32.mrf.mxu1  ;;  %1952 = vperm.xlu2 %2342, %v1818_v48  }
  0xfb   : > { %2238 = vmatmul.msk.f32.gmra.mxu0 %vm538_vm0, %v335_v25 }
  0xfc   : > { %2286 = vmatmul.msk.f32.gmra.mxu1 %vm538_vm0, %v335_v25  ;;  %v2990_v25 = vpop.permute.xlu2 %410 }
  0xff   : > { %1957 = vperm.xlu0 %2340, %v1819_v27   ;;  %1962 = vperm.xlu1 %2341, %v1820_v28   ;;  %v344_v28 = vld [vmem:[%s4049_s1 + $0xf0] sm:$0xff] }
 0x100   : > { %v2875_v29 = vpop.f32.mrf.mxu0 }
 0x101   : > { %v2877_v30 = vpop.f32.mrf.mxu1  ;;  %1967 = vperm.xlu2 %2342, %v1821_v54  }
 0x103   : > { %2239 = vmatmul.msk.f32.gmra.mxu0 %vm538_vm0, %v336_v31 }
 0x104   : > { %2287 = vmatmul.msk.f32.gmra.mxu1 %vm538_vm0, %v336_v31  ;;  %v2999_v31 = vpop.permute.xlu1 %500 }
 0x107   : > { %1972 = vperm.xlu0 %2340, %v1822_v33   ;;  %1977 = vperm.xlu1 %2341, %v1823_v34   ;;  %v3005_v33 = vpop.permute.xlu2 %490 }
 0x108   : > { %v2897_v37 = vpop.f32.mrf.mxu0 }
 0x109   : > { %v2899_v38 = vpop.f32.mrf.mxu1  ;;  %1982 = vperm.xlu2 %2342, %v1824_v61  }
 0x10b   : > { %2240 = vmatmul.msk.f32.gmra.mxu0 %vm538_vm0, %v337_v39 }
 0x10c   : > { %2288 = vmatmul.msk.f32.gmra.mxu1 %vm538_vm0, %v337_v39  ;;  %v3014_v48 = vpop.permute.xlu1 %405 }
 0x10f   : > { %2126 = vperm.xlu0 %2340, %v2123_v41  }
 0x110   : > { %v2913_v44 = vpop.f32.mrf.mxu0 }
 0x111   : > { %v2915_v45 = vpop.f32.mrf.mxu1 }
 0x113   : > { %2241 = vmatmul.msk.f32.gmra.mxu0 %vm538_vm0, %v338_v46 }
 0x114   : > { %2289 = vmatmul.msk.f32.gmra.mxu1 %vm538_vm0, %v338_v46 }
 0x118   : > { %v2927_v49 = vpop.f32.mrf.mxu0 }
 0x119   : > { %v2929_v50 = vpop.f32.mrf.mxu1 }
 0x11b   : > { %2242 = vmatmul.msk.f32.gmra.mxu0 %vm538_vm0, %v339_v51 }
 0x11c   : > { %2290 = vmatmul.msk.f32.gmra.mxu1 %vm538_vm0, %v339_v51 }
 0x120   : > { %v778_v56 = vpop.f32.mrf.mxu0 }
 0x121   : > { %v2945_v59 = vpop.f32.mrf.mxu1 }
 0x123   : > { %2243 = vmatmul.msk.f32.gmra.mxu0 %vm538_vm0, %v340_v60 }
 0x124   : > { %2291 = vmatmul.msk.f32.gmra.mxu1 %vm538_vm0, %v340_v60  ;;  %v3019_v60 = vpop.permute.xlu0 %400 }
 0x128   : > { %v781_v3 = vpop.f32.mrf.mxu0 }
 0x129   : > { %v2961_v4 = vpop.f32.mrf.mxu1 }
 0x12b   : > { %2244 = vmatmul.msk.f32.gmra.mxu0 %vm538_vm0, %v341_v7 }
 0x12c   : > { %2292 = vmatmul.msk.f32.gmra.mxu1 %vm538_vm0, %v341_v7 }
 0x130   : > { %v784_v13 = vpop.f32.mrf.mxu0 }
 0x131   : > { %v2974_v14 = vpop.f32.mrf.mxu1  ;;  %v785_v61 = vadd.f32 %v784_v13, %v2920_v47  ;;  %v776_v13 = vadd.f32 %v2927_v49, %v2959_v2 }
 0x133   : > { %2245 = vmatmul.msk.f32.gmra.mxu0 %vm538_vm0, %v342_v15 }
 0x134   : > { %2293 = vmatmul.msk.f32.gmra.mxu1 %vm538_vm0, %v342_v15  ;;  %v3022_v15 = vpop.permute.xlu2 %395 }
 0x138   : > { %v787_v20 = vpop.f32.mrf.mxu0 }
 0x139   : > { %v2985_v21 = vpop.f32.mrf.mxu1  ;;  %v788_v51 = vadd.f32 %v787_v20, %v2936_v53 }
 0x13b   : > { %2246 = vmatmul.msk.f32.gmra.mxu0 %vm538_vm0, %v343_v22 }
 0x13c   : > { %2294 = vmatmul.msk.f32.gmra.mxu1 %vm538_vm0, %v343_v22  ;;  %v782_v22 = vadd.f32 %v781_v3, %v2955_v1  ;;  %v773_v3 = vadd.f32 %v2913_v44, %v2983_v19  ;;  %v3040_v49 = vpop.permute.xlu2 %475 }
 0x13e   : > { %v973_v44 = vmax.f32 %v773_v3, 0.0 }
 0x140   : > { %v790_v26 = vpop.f32.mrf.mxu0 }
 0x141   : > { %v2994_v27 = vpop.f32.mrf.mxu1  ;;  %v791_v41 = vadd.f32 %v790_v26, %v2909_v42  ;;  %v983_v26 = vmax.f32 %v788_v51, 0.0 }
 0x143   : > { %2247 = vmatmul.msk.f32.gmra.mxu0 %vm538_vm0, %v344_v28  ;;  %v985_v7 = vmax.f32 %v791_v41, 0.0  ;;  %v979_v41 = vmax.f32 %v782_v22, 0.0  ;;  %v767_v22 = vadd.f32 %v2875_v29, %v2990_v25  ;;  %v758_v29 = vadd.f32 %v2821_v11, %v3022_v15 }
 0x144   : > { %2295 = vmatmul.msk.f32.gmra.mxu1 %vm538_vm0, %v344_v28 }
 0x145   : > { %v963_v11 = vmax.f32 %v758_v29, 0.0  ;;  %v901_v29 = vadd.f32 %v2985_v21, %v2936_v53  ;;  %v895_v21 = vadd.f32 %v2961_v4, %v2955_v1  ;;  %v3110_v1 = vld [vmem:[%s4051_s3 + $0xf0] sm:$0xff] }
 0x146   : > { %4127 = vst [vmem:[#allocation4_spill] sm:$0xff] %v3110_v1 }
 0x147   : > { %v980_v4 = vmax.f32 %v895_v21, 0.0 }
 0x148   : > { %v793_v34 = vpop.f32.mrf.mxu0 }
 0x149   : > { %v3007_v39 = vpop.f32.mrf.mxu1  ;;  %v794_v46 = vadd.f32 %v793_v34, %v2893_v35  ;;  %v779_v34 = vadd.f32 %v778_v56, %v2953_v62  ;;  %v770_v56 = vadd.f32 %v2897_v37, %v2981_v16 }
 0x14b   : > { %2248 = vmatmul.msk.f32.gmra.mxu0 %vm538_vm0, %v345_v40  ;;  %v987_v54 = vmax.f32 %v794_v46, 0.0  ;;  %v3032_v46 = vpop.permute.xlu1 %485  ;;  %v977_v51 = vmax.f32 %v779_v34, 0.0  ;;  %v764_v34 = vadd.f32 %v2857_v23, %v3014_v48  ;;  %v971_v37 = vmax.f32 %v770_v56, 0.0 }
 0x14c   : > { %2296 = vmatmul.msk.f32.gmra.mxu1 %vm538_vm0, %v345_v40  ;;  %v981_v40 = vmax.f32 %v785_v61, 0.0  ;;  %v975_v61 = vmax.f32 %v776_v13, 0.0  ;;  %v969_v13 = vmax.f32 %v767_v22, 0.0 }
 0x14d   : > { %1277 = vmatpush.msrb.mxu0 %v987_v54  ;;  %2299 = vmatpush.msra.mxu2 %v987_v54  ;;  %v3036_v54 = vpop.permute.xlu0 %480  ;;  %v967_v3 = vmax.f32 %v764_v34, 0.0 }
 0x14f   : > { %1278 = vmatpush.msrb.mxu0 %v985_v7  ;;  %2300 = vmatpush.msra.mxu2 %v985_v7 }
 0x150   : > { %v3025_v20 = vpop.f32.mrf.mxu0 }
 0x151   : > { %v3027_v28 = vpop.f32.mrf.mxu1  ;;  %1279 = vmatpush.msrb.mxu0 %v983_v26  ;;  %2301 = vmatpush.msra.mxu2 %v983_v26 }
 0x153   : > { %1280 = vmatpush.msrb.mxu0 %v981_v40  ;;  %2302 = vmatpush.msra.mxu2 %v981_v40  ;;  %v761_v40 = vadd.f32 %v2839_v17, %v3019_v60 }
 0x155   : > { %1281 = vmatpush.msrb.mxu0 %v979_v41  ;;  %2303 = vmatpush.msra.mxu2 %v979_v41  ;;  %v3052_v41 = vpop.permute.xlu1 %390  ;;  %v965_v17 = vmax.f32 %v761_v40, 0.0  ;;  %v904_v40 = vadd.f32 %v2994_v27, %v2909_v42  ;;  %v3086_v42 = vld [vmem:[%s4051_s3 + $0xe0] sm:$0xff] }
 0x156   : > { %v755_v56 = vadd.f32 %v2803_v5, %v3052_v41  ;;  %4126 = vst [vmem:[#allocation3_spill] sm:$0xff] %v3086_v42 }
 0x157   : > { %1282 = vmatpush.msrb.mxu0 %v977_v51  ;;  %2304 = vmatpush.msra.mxu2 %v977_v51  ;;  %v3056_v51 = vpop.permute.xlu0 %385  ;;  %v986_v53 = vmax.f32 %v904_v40, 0.0 }
 0x158   : > { %v3042_v7 = vpop.f32.mrf.mxu0  ;;  %v752_v22 = vadd.f32 %v2785_v63, %v3056_v51  ;;  %v961_v5 = vmax.f32 %v755_v56, 0.0  ;;  %v984_v56 = vmax.f32 %v901_v29, 0.0 }
 0x159   : > { %v3046_v26 = vpop.f32.mrf.mxu1  ;;  %1283 = vmatpush.msrb.mxu0 %v975_v61  ;;  %2305 = vmatpush.msra.mxu2 %v975_v61  ;;  %v3062_v61 = vpop.permute.xlu2 %380 }
 0x15a   : > { %v749_v34 = vadd.f32 %v2767_v57, %v3062_v61  ;;  %v959_v63 = vmax.f32 %v752_v22, 0.0 }
 0x15b   : > { %1284 = vmatpush.msrb.mxu0 %v973_v44  ;;  %2306 = vmatpush.msra.mxu2 %v973_v44 }
 0x15c   : > { %v957_v57 = vmax.f32 %v749_v34, 0.0  ;;  %v880_v34 = vadd.f32 %v2877_v30, %v2990_v25 }
 0x15d   : > { %1285 = vmatpush.msrb.mxu0 %v971_v37  ;;  %2307 = vmatpush.msra.mxu2 %v971_v37  ;;  %v907_v37 = vadd.f32 %v3007_v39, %v2893_v35  ;;  %v3081_v35 = vld [vmem:[%s4051_s3] sm:$0xff]  ;;  %v898_v39 = vadd.f32 %v2974_v14, %v2920_v47  ;;  %v889_v14 = vadd.f32 %v2929_v50, %v2959_v2 }
 0x15e   : > { %v883_v50 = vadd.f32 %v2899_v38, %v2981_v16  ;;  %v3134_v38 = vld [vmem:[%s4051_s3 + $0x100] sm:$0xff]  ;;  %v874_v16 = vadd.f32 %v2841_v18, %v3019_v60  ;;  %v970_v25 = vmax.f32 %v880_v34, 0.0  ;;  %v3151_v18 = vld [vmem:[%s4051_s3 + $0x30] sm:$0xff] }
 0x15f   : > { %1286 = vmatpush.msrb.mxu0 %v969_v13  ;;  %2308 = vmatpush.msra.mxu2 %v969_v13  ;;  %v988_v27 = vmax.f32 %v907_v37, 0.0  ;;  %v982_v22 = vmax.f32 %v898_v39, 0.0  ;;  %v976_v2 = vmax.f32 %v889_v14, 0.0  ;;  %4128 = vst [vmem:[#allocation5_spill] sm:$0xff] %v3134_v38  ;;  %v3156_v60 = vld [vmem:[%s4051_s3 + $0x110] sm:$0xff] }
 0x160   : > { %v3058_v23 = vpop.f32.mrf.mxu0  ;;  %v972_v30 = vmax.f32 %v883_v50, 0.0  ;;  %4129 = vst [vmem:[#allocation6_spill] sm:$0xff] %v3156_v60  ;;  %v3218_v34 = vld [vmem:[%s4051_s3 + $0x150] sm:$0xff] }
 0x161   : > { %1287 = vmatpush.msrb.mxu0 %v967_v3  ;;  %2309 = vmatpush.msra.mxu2 %v967_v3  ;;  %v3066_v44 = vpop.f32.mrf.mxu1  ;;  %4133 = vst [vmem:[#allocation10_spill] sm:$0xff] %v3218_v34 }
 0x163   : > { %1288 = vmatpush.msrb.mxu0 %v965_v17  ;;  %2310 = vmatpush.msra.mxu2 %v965_v17  ;;  %v892_v17 = vadd.f32 %v2945_v59, %v2953_v62  ;;  %v886_v59 = vadd.f32 %v2915_v45, %v2983_v19  ;;  %v877_v45 = vadd.f32 %v2859_v24, %v3014_v48  ;;  %v3129_v19 = vld [vmem:[%s4051_s3 + $0x20] sm:$0xff] }
 0x164   : > { %v871_v48 = vadd.f32 %v2823_v12, %v3022_v15  ;;  %v865_v12 = vadd.f32 %v2787_v0, %v3056_v51  ;;  %v3169_v0 = vld [vmem:[%s4051_s3 + $0x40] sm:$0xff] }
 0x165   : > { %1289 = vmatpush.msrb.mxu0 %v963_v11  ;;  %2311 = vmatpush.msra.mxu2 %v963_v11  ;;  %v3105_v11 = vld [vmem:[%s4051_s3 + $0x10] sm:$0xff]  ;;  %v978_v62 = vmax.f32 %v892_v17, 0.0  ;;  %v968_v24 = vmax.f32 %v877_v45, 0.0  ;;  %v3174_v51 = vld [vmem:[%s4051_s3 + $0x120] sm:$0xff] }
 0x166   : > { %v964_v15 = vmax.f32 %v871_v48, 0.0  ;;  %v960_v39 = vmax.f32 %v865_v12, 0.0  ;;  %4130 = vst [vmem:[#allocation7_spill] sm:$0xff] %v3174_v51  ;;  %v3190_v17 = vld [vmem:[%s4051_s3 + $0x130] sm:$0xff]  ;;  %v3253_v12 = vld [vmem:[%s4051_s3 + $0xa0] sm:$0xff] }
 0x167   : > { %1290 = vmatpush.msrb.mxu0 %v961_v5  ;;  %2312 = vmatpush.msra.mxu2 %v961_v5  ;;  %v974_v5 = vmax.f32 %v886_v59, 0.0  ;;  %4131 = vst [vmem:[#allocation8_spill] sm:$0xff] %v3190_v17  ;;  %v3204_v59 = vld [vmem:[%s4051_s3 + $0x140] sm:$0xff]  ;;  %v3244_v48 = vld [vmem:[%s4051_s3 + $0x170] sm:$0xff] }
 0x168   : > { %v3074_v13 = vpop.f32.mrf.mxu0  ;;  %4132 = vst [vmem:[#allocation9_spill] sm:$0xff] %v3204_v59 }
 0x169   : > { %1291 = vmatpush.msrb.mxu0 %v959_v63  ;;  %2313 = vmatpush.msra.mxu2 %v959_v63  ;;  %v3094_v3 = vpop.f32.mrf.mxu1  ;;  %v966_v63 = vmax.f32 %v874_v16, 0.0  ;;  %v3232_v16 = vld [vmem:[%s4051_s3 + $0x160] sm:$0xff]  ;;  %4135 = vst [vmem:[#allocation12_spill] sm:$0xff] %v3244_v48 }
 0x16a   : > { %4134 = vst [vmem:[#allocation11_spill] sm:$0xff] %v3232_v16 }
 0x16b   : > { %1292 = vmatpush.msrb.mxu0 %v957_v57  ;;  %2314 = vmatpush.msra.mxu2 %v957_v57  ;;  %v868_v57 = vadd.f32 %v2805_v6, %v3052_v41  ;;  %v862_v6 = vadd.f32 %v2769_v58, %v3062_v61  ;;  %v3185_v61 = vld [vmem:[%s4051_s3 + $0x50] sm:$0xff] }
 0x16c   : > { %1293 = vmatmul.f32.vlgmr.msrb.gmra.mxu0 %v3081_v35  ;;  %1335 = vmatmul.f32.vlgmr.msra.gmra.mxu2 %v3086_v42 }
 0x16d   : > { %1503 = vmatpush.msrb.mxu2 %v988_v27  ;;  %v962_v41 = vmax.f32 %v868_v57, 0.0  ;;  %v958_v21 = vmax.f32 %v862_v6, 0.0 }
 0x16f   : > { %1504 = vmatpush.msrb.mxu2 %v986_v53 }
 0x170   : > { %v3098_v47 = vpop.f32.mrf.mxu0 }
 0x171   : > { %1505 = vmatpush.msrb.mxu2 %v984_v56  ;;  %v3120_v37 = vpop.f32.mrf.mxu1 }
 0x173   : > { %1506 = vmatpush.msrb.mxu2 %v982_v22 }
 0x174   : > { %1296 = vmatmul.f32.gmra.mxu0 %v3105_v11  ;;  %1338 = vmatmul.f32.gmra.mxu2 %v3110_v1 }
 0x175   : > { %1507 = vmatpush.msrb.mxu2 %v980_v4  ;;  %v3199_v4 = vld [vmem:[%s4051_s3 + $0x60] sm:$0xff] }
 0x177   : > { %1508 = vmatpush.msrb.mxu2 %v978_v62 }
 0x178   : > { %v3122_v40 = vpop.f32.mrf.mxu0 }
 0x179   : > { %1509 = vmatpush.msrb.mxu2 %v976_v2  ;;  %v3146_v27 = vpop.f32.mrf.mxu1  ;;  %v3213_v2 = vld [vmem:[%s4051_s3 + $0x70] sm:$0xff] }
 0x17b   : > { %1510 = vmatpush.msrb.mxu2 %v974_v5 }
 0x17c   : > { %1299 = vmatmul.f32.gmra.mxu0 %v3129_v19  ;;  %1341 = vmatmul.f32.gmra.mxu2 %v3134_v38 }
 0x17d   : > { %1511 = vmatpush.msrb.mxu2 %v972_v30  ;;  %v3227_v30 = vld [vmem:[%s4051_s3 + $0x80] sm:$0xff] }
 0x17f   : > { %1512 = vmatpush.msrb.mxu2 %v970_v25 }
 0x180   : > { %v3142_v29 = vpop.f32.mrf.mxu0 }
 0x181   : > { %1513 = vmatpush.msrb.mxu2 %v968_v24  ;;  %v3176_v56 = vpop.f32.mrf.mxu1  ;;  %v3239_v24 = vld [vmem:[%s4051_s3 + $0x90] sm:$0xff] }
 0x183   : > { %1514 = vmatpush.msrb.mxu2 %v966_v63 }
 0x184   : > { %1302 = vmatmul.f32.gmra.mxu0 %v3151_v18  ;;  %1344 = vmatmul.f32.gmra.mxu2 %v3156_v60 }
 0x185   : > { %1515 = vmatpush.msrb.mxu2 %v964_v15  ;;  %v3258_v15 = vld [vmem:[%s4051_s3 + $0x180] sm:$0xff] }
 0x186   : > { %4136 = vst [vmem:[#allocation13_spill] sm:$0xff] %v3258_v15 }
 0x187   : > { %1516 = vmatpush.msrb.mxu2 %v962_v41 }
 0x188   : > { %v3164_v53 = vpop.f32.mrf.mxu0 }
 0x189   : > { %1517 = vmatpush.msrb.mxu2 %v960_v39  ;;  %v3194_v22 = vpop.f32.mrf.mxu1  ;;  %v3267_v39 = vld [vmem:[%s4051_s3 + $0xb0] sm:$0xff] }
 0x18a   : > { %4137 = vst [vmem:[#allocation14_spill] sm:$0xff] %v3267_v39 }
 0x18b   : > { %1518 = vmatpush.msrb.mxu2 %v958_v21  ;;  %v3272_v21 = vld [vmem:[%s4051_s3 + $0x190] sm:$0xff] }
 0x18c   : > { %1305 = vmatmul.f32.gmra.mxu0 %v3169_v0  ;;  %1347 = vmatmul.f32.gmra.mxu2 %v3174_v51  ;;  %4138 = vst [vmem:[#allocation15_spill] sm:$0xff] %v3272_v21 }
 0x190   : > { %v3180_v58 = vpop.f32.mrf.mxu0 }
 0x191   : > { %v3208_v62 = vpop.f32.mrf.mxu1 }
 0x194   : > { %1308 = vmatmul.f32.gmra.mxu0 %v3185_v61  ;;  %1350 = vmatmul.f32.gmra.mxu2 %v3190_v17  ;;  %v3288_v17 = vld [vmem:[%s4051_s3 + $0x1a0] sm:$0xff] }
 0x198   : > { %v823_v14 = vpop.f32.mrf.mxu0 }
 0x199   : > { %v3222_v45 = vpop.f32.mrf.mxu1 }
 0x19c   : > { %1311 = vmatmul.f32.gmra.mxu0 %v3199_v4  ;;  %1353 = vmatmul.f32.gmra.mxu2 %v3204_v59  ;;  %v3283_v59 = vld [vmem:[%s4051_s3 + $0xc0] sm:$0xff] }
 0x1a0   : > { %v826_v50 = vpop.f32.mrf.mxu0 }
 0x1a1   : > { %v3246_v63 = vpop.f32.mrf.mxu1  ;;  %v827_v1 = vadd.f32 %v826_v50, %v2968_v8 }
 0x1a3   : > { %v1009_v50 = vmax.f32 %v827_v1, 0.0  ;;  %v3322_v1 = vpop.permute.xlu1 %470 }
 0x1a4   : > { %1314 = vmatmul.f32.gmra.mxu0 %v3213_v2  ;;  %1356 = vmatmul.f32.gmra.mxu2 %v3218_v34 }
 0x1a8   : > { %v829_v5 = vpop.f32.mrf.mxu0 }
 0x1a9   : > { %v3262_v6 = vpop.f32.mrf.mxu1  ;;  %v830_v60 = vadd.f32 %v829_v5, %v2970_v9 }
 0x1ab   : > { %v1011_v5 = vmax.f32 %v830_v60, 0.0  ;;  %v815_v60 = vadd.f32 %v3142_v29, %v3005_v33  ;;  %v809_v29 = vadd.f32 %v3098_v47, %v3036_v54  ;;  %v3338_v47 = vpop.permute.xlu0 %465 }
 0x1ac   : > { %1317 = vmatmul.f32.gmra.mxu0 %v3227_v30  ;;  %1359 = vmatmul.f32.gmra.mxu2 %v3232_v16 }
 0x1b0   : > { %v832_v25 = vpop.f32.mrf.mxu0 }
 0x1b4   : > { %1320 = vmatmul.f32.gmra.mxu0 %v3239_v24  ;;  %1362 = vmatmul.f32.gmra.mxu2 %v3244_v48  ;;  %v3276_v48 = vpop.f32.mrf.mxu1 }
 0x1b8   : > { %v835_v57 = vpop.f32.mrf.mxu0 }
 0x1b9   : > { %v836_v51 = vadd.f32 %v835_v57, %v2934_v52 }
 0x1bb   : > { %v1015_v38 = vmax.f32 %v836_v51, 0.0  ;;  %v824_v51 = vadd.f32 %v823_v14, %v2972_v10  ;;  %v3320_v14 = vld [vmem:[%s4051_s3 + $0x1c0] sm:$0xff] }
 0x1bc   : > { %1323 = vmatmul.f32.gmra.mxu0 %v3253_v12  ;;  %1365 = vmatmul.f32.gmra.mxu2 %v3258_v15  ;;  %4140 = vst [vmem:[#allocation17_spill] sm:$0xff] %v3320_v14 }
 0x1bd   : > { %v1007_v57 = vmax.f32 %v824_v51, 0.0 }
 0x1c0   : > { %v838_v41 = vpop.f32.mrf.mxu0 }
 0x1c1   : > { %v839_v16 = vadd.f32 %v838_v41, %v2895_v36  ;;  %v833_v41 = vadd.f32 %v832_v25, %v2941_v55  ;;  %v818_v25 = vadd.f32 %v3164_v53, %v3001_v32 }
 0x1c3   : > { %v1013_v42 = vmax.f32 %v833_v41, 0.0  ;;  %v1003_v53 = vmax.f32 %v818_v25, 0.0  ;;  %v1001_v41 = vmax.f32 %v815_v60, 0.0  ;;  %v3342_v25 = vpop.permute.xlu1 %460 }
 0x1c4   : > { %1326 = vmatmul.f32.gmra.mxu0 %v3267_v39  ;;  %1368 = vmatmul.f32.gmra.mxu2 %v3272_v21  ;;  %v3296_v39 = vpop.f32.mrf.mxu1 }
 0x1c8   : > { %v841_v15 = vpop.f32.mrf.mxu0 }
 0x1c9   : > { %v842_v34 = vadd.f32 %v841_v15, %v2911_v43  ;;  %v1017_v15 = vmax.f32 %v839_v16, 0.0  ;;  %v3306_v16 = vld [vmem:[%s4051_s3 + $0x1b0] sm:$0xff] }
 0x1ca   : > { %4139 = vst [vmem:[#allocation16_spill] sm:$0xff] %v3306_v16 }
 0x1cb   : > { %v1019_v21 = vmax.f32 %v842_v34, 0.0  ;;  %v3301_v34 = vld [vmem:[%s4051_s3 + $0xd0] sm:$0xff] }
 0x1cc   : > { %1329 = vmatmul.f32.gmra.mxu0 %v3283_v59  ;;  %1371 = vmatmul.f32.gmra.mxu2 %v3288_v17 }
 0x1cd   : > { %1390 = vmatpush.msrb.mxu1 %v1019_v21  ;;  %2315 = vmatpush.msra.mxu3 %v1019_v21  ;;  %v951_v21 = vpop.f32.mrf.mxu1 }
 0x1cf   : > { %1391 = vmatpush.msrb.mxu1 %v1017_v15  ;;  %2316 = vmatpush.msra.mxu3 %v1017_v15  ;;  %v806_v15 = vadd.f32 %v3074_v13, %v3040_v49 }
 0x1d1   : > { %1392 = vmatpush.msrb.mxu1 %v1015_v38  ;;  %2317 = vmatpush.msra.mxu3 %v1015_v38  ;;  %v821_v38 = vadd.f32 %v3180_v58, %v2999_v31  ;;  %v812_v58 = vadd.f32 %v3122_v40, %v3032_v46  ;;  %v803_v40 = vadd.f32 %v3058_v23, %v3322_v1  ;;  %v995_v13 = vmax.f32 %v806_v15, 0.0 }
 0x1d2   : > { %v797_v23 = vadd.f32 %v3025_v20, %v3342_v25  ;;  %v3356_v20 = vld [vmem:[%s4051_s3 + $0x8] sm:$0xff] }
 0x1d3   : > { %1393 = vmatpush.msrb.mxu1 %v1013_v42  ;;  %2318 = vmatpush.msra.mxu3 %v1013_v42  ;;  %v1005_v42 = vmax.f32 %v821_v38, 0.0  ;;  %v999_v51 = vmax.f32 %v812_v58, 0.0  ;;  %v3336_v38 = vld [vmem:[%s4051_s3 + $0x1d0] sm:$0xff]  ;;  %v993_v60 = vmax.f32 %v803_v40, 0.0 }
 0x1d4   : > { %1332 = vmatmul.f32.gmra.mxu0 %v3301_v34  ;;  %1374 = vmatmul.f32.gmra.mxu2 %v3306_v16  ;;  %4141 = vst [vmem:[#allocation18_spill] sm:$0xff] %v3336_v38 }
 0x1d5   : > { %1394 = vmatpush.msrb.mxu1 %v1011_v5  ;;  %2319 = vmatpush.msra.mxu3 %v1011_v5  ;;  %v997_v5 = vmax.f32 %v809_v29, 0.0  ;;  %v952_v29 = vadd.f32 %v951_v21, %v2895_v36  ;;  %v946_v36 = vadd.f32 %v3276_v48, %v2941_v55  ;;  %v3383_v55 = vld [vmem:[%s4051_s3 + $0x18] sm:$0xff]  ;;  %v937_v48 = vadd.f32 %v3222_v45, %v2972_v10 }
 0x1d6   : > { %v928_v10 = vadd.f32 %v3176_v56, %v3005_v33  ;;  %v922_v33 = vadd.f32 %v3120_v37, %v3036_v54  ;;  %v3432_v54 = vld [vmem:[%s4051_s3 + $0x118] sm:$0xff]  ;;  %v910_v37 = vadd.f32 %v3027_v28, %v3342_v25  ;;  %v3460_v25 = vpop.permute.xlu0 %1124 }
 0x1d7   : > { %1395 = vmatpush.msrb.mxu1 %v1009_v50  ;;  %2320 = vmatpush.msra.mxu3 %v1009_v50  ;;  %v800_v50 = vadd.f32 %v3042_v7, %v3338_v47  ;;  %v989_v7 = vmax.f32 %v797_v23, 0.0  ;;  %v1018_v21 = vmax.f32 %v952_v29, 0.0  ;;  %4147 = vst [vmem:[#allocation24_spill] sm:$0xff] %v3432_v54 }
 0x1d8   : > { %v1002_v56 = vmax.f32 %v928_v10, 0.0  ;;  %4150 = vst [vmem:[#allocation27_spill] sm:$0xff] %v3460_v25 }
 0x1d9   : > { %1396 = vmatpush.msrb.mxu1 %v1007_v57  ;;  %2321 = vmatpush.msra.mxu3 %v1007_v57  ;;  %v954_v57 = vpop.f32.mrf.mxu1 }
 0x1da   : > { %v955_v58 = vadd.f32 %v954_v57, %v2911_v43  ;;  %v949_v43 = vadd.f32 %v3296_v39, %v2934_v52  ;;  %v3376_v52 = vld [vmem:[%s4051_s3 + $0x1f0] sm:$0xff]  ;;  %v940_v39 = vadd.f32 %v3246_v63, %v2968_v8  ;;  %v934_v8 = vadd.f32 %v3208_v62, %v2999_v31  ;;  %v3406_v57 = vld [vmem:[%s4051_s3 + $0x28] sm:$0xff] }
 0x1db   : > { %1397 = vmatpush.msrb.mxu1 %v1005_v42  ;;  %2322 = vmatpush.msra.mxu3 %v1005_v42  ;;  %v991_v42 = vmax.f32 %v800_v50, 0.0  ;;  %4144 = vst [vmem:[#allocation21_spill] sm:$0xff] %v3376_v52  ;;  %v931_v50 = vadd.f32 %v3194_v22, %v3001_v32  ;;  %v3411_v31 = vld [vmem:[%s4051_s3 + $0x108] sm:$0xff]  ;;  %v925_v32 = vadd.f32 %v3146_v27, %v3032_v46  ;;  %v998_v27 = vmax.f32 %v922_v33, 0.0 }
 0x1dc   : > { %1377 = vmatmul.f32.gmra.mxu2 %v3320_v14  ;;  %v1020_v15 = vmax.f32 %v955_v58, 0.0  ;;  %v1016_v40 = vmax.f32 %v949_v43, 0.0  ;;  %v1010_v63 = vmax.f32 %v940_v39, 0.0  ;;  %v1006_v45 = vmax.f32 %v934_v8, 0.0  ;;  %4146 = vst [vmem:[#allocation23_spill] sm:$0xff] %v3411_v31  ;;  %v3469_v43 = vld [vmem:[%s4051_s3 + $0x58] sm:$0xff] }
 0x1dd   : > { %1398 = vmatpush.msrb.mxu1 %v1003_v53  ;;  %2323 = vmatpush.msra.mxu3 %v1003_v53  ;;  %v3351_v53 = vld [vmem:[%s4051_s3 + $0x1e0] sm:$0xff]  ;;  %v1004_v22 = vmax.f32 %v931_v50, 0.0  ;;  %v919_v62 = vadd.f32 %v3094_v3, %v3040_v49  ;;  %v916_v46 = vadd.f32 %v3066_v44, %v3322_v1  ;;  %v913_v49 = vadd.f32 %v3046_v26, %v3338_v47  ;;  %v3453_v47 = vld [vmem:[%s4051_s3 + $0x128] sm:$0xff] }
 0x1de   : > { %4142 = vst [vmem:[#allocation19_spill] sm:$0xff] %v3351_v53  ;;  %v990_v26 = vmax.f32 %v910_v37, 0.0  ;;  %v3529_v50 = vld [vmem:[%s4051_s3 + $0x168] sm:$0xff] }
 0x1df   : > { %1399 = vmatpush.msrb.mxu1 %v1001_v41  ;;  %2324 = vmatpush.msra.mxu3 %v1001_v41  ;;  %v3362_v41 = vld [vmem:[%s4051_s3 + $0xe8] sm:$0xff]  ;;  %v996_v44 = vmax.f32 %v919_v62, 0.0  ;;  %v994_v1 = vmax.f32 %v916_v46, 0.0  ;;  %v992_v58 = vmax.f32 %v913_v49, 0.0  ;;  %4149 = vst [vmem:[#allocation26_spill] sm:$0xff] %v3453_v47  ;;  %v3583_v49 = vld [vmem:[%s4051_s3 + $0xb8] sm:$0xff] }
 0x1e0   : > { %4143 = vst [vmem:[#allocation20_spill] sm:$0xff] %v3362_v41 }
 0x1e1   : > { %1400 = vmatpush.msrb.mxu1 %v999_v51  ;;  %2325 = vmatpush.msra.mxu3 %v999_v51  ;;  %v943_v51 = vadd.f32 %v3262_v6, %v2970_v9  ;;  %v3388_v9 = vld [vmem:[%s4051_s3 + $0xf8] sm:$0xff]  ;;  %4156 = vst [vmem:[#allocation33_spill] sm:$0xff] %v3529_v50 }
 0x1e2   : > { %4145 = vst [vmem:[#allocation22_spill] sm:$0xff] %v3388_v9 }
 0x1e3   : > { %1401 = vmatpush.msrb.mxu1 %v997_v5  ;;  %2326 = vmatpush.msra.mxu3 %v997_v5  ;;  %v1014_v5 = vmax.f32 %v946_v36, 0.0  ;;  %v1012_v6 = vmax.f32 %v943_v51, 0.0  ;;  %v3481_v36 = vpop.permute.xlu0 %1139  ;;  %v3491_v51 = vld [vmem:[%s4051_s3 + $0x148] sm:$0xff]  ;;  %4163 = vst [vmem:[#allocation40_spill] sm:$0xff] %v3583_v49 }
 0x1e4   : > { %1380 = vmatmul.f32.gmra.mxu2 %v3336_v38  ;;  %4154 = vst [vmem:[#allocation31_spill] sm:$0xff] %v3491_v51 }
 0x1e5   : > { %1402 = vmatpush.msrb.mxu1 %v995_v13  ;;  %2327 = vmatpush.msra.mxu3 %v995_v13  ;;  %v1008_v13 = vmax.f32 %v937_v48, 0.0  ;;  %v3510_v48 = vld [vmem:[%s4051_s3 + $0x158] sm:$0xff] }
 0x1e6   : > { %4155 = vst [vmem:[#allocation32_spill] sm:$0xff] %v3510_v48 }
 0x1e7   : > { %1403 = vmatpush.msrb.mxu1 %v993_v60  ;;  %2328 = vmatpush.msra.mxu3 %v993_v60  ;;  %v1000_v60 = vmax.f32 %v925_v32, 0.0  ;;  %v3545_v32 = vld [vmem:[%s4051_s3 + $0x98] sm:$0xff] }
 0x1e9   : > { %1404 = vmatpush.msrb.mxu1 %v991_v42  ;;  %2329 = vmatpush.msra.mxu3 %v991_v42  ;;  %v3443_v42 = vpop.permute.xlu2 %1119 }
 0x1ea   : > { %4148 = vst [vmem:[#allocation25_spill] sm:$0xff] %v3443_v42 }
 0x1eb   : > { %1405 = vmatpush.msrb.mxu1 %v989_v7  ;;  %2330 = vmatpush.msra.mxu3 %v989_v7  ;;  %v3462_v7 = vpop.permute.xlu1 %1129 }
 0x1ec   : > { %1383 = vmatmul.f32.gmra.mxu2 %v3351_v53  ;;  %1406 = vmatmul.f32.vlgmr.msrb.gmra.mxu1 %v3356_v20  ;;  %4151 = vst [vmem:[#allocation28_spill] sm:$0xff] %v3462_v7  ;;  %v3657_v53 = vld [vmem:[%s4051_s3 + $0x1d8] sm:$0xff] }
 0x1ed   : > { %1448 = vmatmul.f32.vlgmr.msra.gmra.mxu3 %v3362_v41  ;;  %4181 = vst [vmem:[#allocation56_spill] sm:$0xff] %v3657_v53 }
 0x1ee   : > { %1616 = vmatpush.msrb.mxu3 %v1020_v15 }
 0x1ef   : > { %v3401_v23 = vpop.f32.mrf.mxu2 }
 0x1f0   : > { %1617 = vmatpush.msrb.mxu3 %v1018_v21  ;;  %v3486_v21 = vld [vmem:[%s4051_s3 + $0x68] sm:$0xff] }
 0x1f1   : > { %v3464_v29 = vpop.permute.xlu2 %1134 }
 0x1f2   : > { %1618 = vmatpush.msrb.mxu3 %v1016_v40  ;;  %4152 = vst [vmem:[#allocation29_spill] sm:$0xff] %v3464_v29 }
 0x1f3   : > { %v3493_v40 = vpop.permute.xlu1 %1144 }
 0x1f4   : > { %1619 = vmatpush.msrb.mxu3 %v1014_v5  ;;  %1386 = vmatmul.f32.gmra.mxu2 %v3376_v52  ;;  %v3505_v5 = vld [vmem:[%s4051_s3 + $0x78] sm:$0xff] }
 0x1f5   : > { %1409 = vmatmul.f32.gmra.mxu1 %v3383_v55  ;;  %1451 = vmatmul.f32.gmra.mxu3 %v3388_v9 }
 0x1f6   : > { %1620 = vmatpush.msrb.mxu3 %v1012_v6  ;;  %v3512_v6 = vpop.permute.xlu0 %1154 }
 0x1f7   : > { %v3436_v3 = vpop.f32.mrf.mxu2 }
 0x1f8   : > { %1621 = vmatpush.msrb.mxu3 %v1010_v63  ;;  %v3524_v63 = vld [vmem:[%s4051_s3 + $0x88] sm:$0xff] }
 0x1fa   : > { %1622 = vmatpush.msrb.mxu3 %v1008_v13 }
 0x1fc   : > { %1623 = vmatpush.msrb.mxu3 %v1006_v45  ;;  %1519 = vmatmul.f32.vlgmr.msrb.gmra.mxu2 %v3081_v35  ;;  %v3427_v35 = vld [vmem:[%s4051_s3 + $0x38] sm:$0xff] }
 0x1fd   : > { %1412 = vmatmul.f32.gmra.mxu1 %v3406_v57  ;;  %1454 = vmatmul.f32.gmra.mxu3 %v3411_v31  ;;  %v3642_v31 = vld [vmem:[%s4051_s3 + $0x1c8] sm:$0xff] }
 0x1fe   : > { %1624 = vmatpush.msrb.mxu3 %v1004_v22  ;;  %v3550_v22 = vld [vmem:[%s4051_s3 + $0x178] sm:$0xff]  ;;  %4178 = vst [vmem:[#allocation53_spill] sm:$0xff] %v3642_v31 }
 0x1ff   : > { %v3458_v28 = vpop.f32.mrf.mxu2  ;;  %4157 = vst [vmem:[#allocation34_spill] sm:$0xff] %v3550_v22 }
 0x200   : > { %1625 = vmatpush.msrb.mxu3 %v1002_v56 }
 0x202   : > { %1626 = vmatpush.msrb.mxu3 %v1000_v60  ;;  %v3566_v60 = vld [vmem:[%s4051_s3 + $0xa8] sm:$0xff] }
 0x204   : > { %1627 = vmatpush.msrb.mxu3 %v998_v27  ;;  %1522 = vmatmul.f32.gmra.mxu2 %v3105_v11  ;;  %v3448_v11 = vld [vmem:[%s4051_s3 + $0x48] sm:$0xff] }
 0x205   : > { %1415 = vmatmul.f32.gmra.mxu1 %v3427_v35  ;;  %1457 = vmatmul.f32.gmra.mxu3 %v3432_v54 }
 0x206   : > { %1628 = vmatpush.msrb.mxu3 %v996_v44  ;;  %v3588_v44 = vld [vmem:[%s4051_s3 + $0x198] sm:$0xff] }
 0x207   : > { %v3479_v15 = vpop.f32.mrf.mxu2  ;;  %4164 = vst [vmem:[#allocation41_spill] sm:$0xff] %v3588_v44 }
 0x208   : > { %1629 = vmatpush.msrb.mxu3 %v994_v1 }
 0x20a   : > { %1630 = vmatpush.msrb.mxu3 %v992_v58  ;;  %v3602_v58 = vld [vmem:[%s4051_s3 + $0xc8] sm:$0xff] }
 0x20b   : > { %4167 = vst [vmem:[#allocation44_spill] sm:$0xff] %v3602_v58 }
 0x20c   : > { %1631 = vmatpush.msrb.mxu3 %v990_v26  ;;  %1525 = vmatmul.f32.gmra.mxu2 %v3129_v19  ;;  %v3474_v19 = vld [vmem:[%s4051_s3 + $0x138] sm:$0xff]  ;;  %v3607_v26 = vld [vmem:[%s4051_s3 + $0x1a8] sm:$0xff] }
 0x20d   : > { %1418 = vmatmul.f32.gmra.mxu1 %v3448_v11  ;;  %1460 = vmatmul.f32.gmra.mxu3 %v3453_v47  ;;  %4153 = vst [vmem:[#allocation30_spill] sm:$0xff] %v3474_v19 }
 0x20e   : > { %4168 = vst [vmem:[#allocation45_spill] sm:$0xff] %v3607_v26 }
 0x20f   : > { %v3500_v39 = vpop.f32.mrf.mxu2 }
 0x214   : > { %1528 = vmatmul.f32.gmra.mxu2 %v3151_v18  ;;  %v3495_v18 = vpop.permute.xlu2 %1149 }
 0x215   : > { %1421 = vmatmul.f32.gmra.mxu1 %v3469_v43  ;;  %1463 = vmatmul.f32.gmra.mxu3 %v3474_v19 }
 0x217   : > { %v3531_v13 = vpop.f32.mrf.mxu2 }
 0x21c   : > { %1531 = vmatmul.f32.gmra.mxu2 %v3169_v0  ;;  %v3517_v0 = vpop.permute.xlu1 %1159  ;;  %v3519_v8 = vpop.permute.xlu2 %1164 }
 0x21d   : > { %1424 = vmatmul.f32.gmra.mxu1 %v3486_v21  ;;  %1466 = vmatmul.f32.gmra.mxu3 %v3491_v51 }
 0x224   : > { %1534 = vmatmul.f32.gmra.mxu2 %v3185_v61  ;;  %v3536_v61 = vpop.permute.xlu0 %1169  ;;  %v3538_v10 = vpop.permute.xlu1 %1174 }
 0x225   : > { %1427 = vmatmul.f32.gmra.mxu1 %v3505_v5  ;;  %1469 = vmatmul.f32.gmra.mxu3 %v3510_v48  ;;  %v3540_v45 = vpop.permute.xlu2 %1179  ;;  %v3626_v48 = vld [vmem:[%s4051_s3 + $0x1b8] sm:$0xff] }
 0x226   : > { %4173 = vst [vmem:[#allocation50_spill] sm:$0xff] %v3626_v48 }
 0x22c   : > { %1537 = vmatmul.f32.gmra.mxu2 %v3199_v4  ;;  %v3555_v4 = vpop.f32.mrf.mxu2  ;;  %v3557_v33 = vpop.permute.xlu0 %1184 }
 0x22d   : > { %1430 = vmatmul.f32.gmra.mxu1 %v3524_v63  ;;  %1472 = vmatmul.f32.gmra.mxu3 %v3529_v50  ;;  %4158 = vst [vmem:[#allocation35_spill] sm:$0xff] %v3557_v33  ;;  %v3559_v56 = vpop.permute.xlu1 %1189  ;;  %v3561_v62 = vpop.permute.xlu2 %1194  ;;  %v3621_v50 = vld [vmem:[%s4051_s3 + $0xd8] sm:$0xff] }
 0x22e   : > { %4159 = vst [vmem:[#allocation36_spill] sm:$0xff] %v3559_v56 }
 0x22f   : > { %4160 = vst [vmem:[#allocation37_spill] sm:$0xff] %v3561_v62 }
 0x230   : > { %4172 = vst [vmem:[#allocation49_spill] sm:$0xff] %v3621_v50 }
 0x234   : > { %1540 = vmatmul.f32.gmra.mxu2 %v3213_v2  ;;  %v3571_v2 = vld [vmem:[%s4051_s3 + $0x188] sm:$0xff]  ;;  %v3576_v46 = vpop.f32.mrf.mxu2  ;;  %v3578_v27 = vpop.permute.xlu0 %1199 }
 0x235   : > { %1433 = vmatmul.f32.gmra.mxu1 %v3545_v32  ;;  %1475 = vmatmul.f32.gmra.mxu3 %v3550_v22  ;;  %4161 = vst [vmem:[#allocation38_spill] sm:$0xff] %v3571_v2  ;;  %v3590_v37 = vpop.permute.xlu1 %1204  ;;  %v1294_v22 = vpop.f32.mrf.mxu0 }
 0x236   : > { %4162 = vst [vmem:[#allocation39_spill] sm:$0xff] %v3578_v27 }
 0x237   : > { %4165 = vst [vmem:[#allocation42_spill] sm:$0xff] %v3590_v37 }
 0x23c   : > { %1543 = vmatmul.f32.gmra.mxu2 %v3227_v30  ;;  %v3592_v30 = vpop.permute.xlu2 %1209  ;;  %v3597_v1 = vpop.f32.mrf.mxu2 }
 0x23d   : > { %1436 = vmatmul.f32.gmra.mxu1 %v3566_v60  ;;  %1478 = vmatmul.f32.gmra.mxu3 %v3571_v2  ;;  %4166 = vst [vmem:[#allocation43_spill] sm:$0xff] %v3592_v30  ;;  %v3609_v2 = vpop.permute.xlu0 %1214  ;;  %v1297_v19 = vpop.f32.mrf.mxu0 }
 0x23e   : > { %4169 = vst [vmem:[#allocation46_spill] sm:$0xff] %v3609_v2 }
 0x244   : > { %1546 = vmatmul.f32.gmra.mxu2 %v3239_v24  ;;  %v3614_v24 = vpop.permute.xlu1 %1219  ;;  %v3628_v51 = vpop.f32.mrf.mxu2 }
 0x245   : > { %1439 = vmatmul.f32.gmra.mxu1 %v3583_v49  ;;  %1481 = vmatmul.f32.gmra.mxu3 %v3588_v44  ;;  %4170 = vst [vmem:[#allocation47_spill] sm:$0xff] %v3614_v24  ;;  %v3616_v44 = vpop.permute.xlu2 %1224 }
 0x246   : > { %4171 = vst [vmem:[#allocation48_spill] sm:$0xff] %v3616_v44 }
 0x24c   : > { %1549 = vmatmul.f32.gmra.mxu2 %v3253_v12  ;;  %v4174_v12 = vld [vmem:[#allocation14_spill] sm:$0xff]  ;;  %v3635_v47 = vpop.permute.xlu1 %1234 }
 0x24d   : > { %1442 = vmatmul.f32.gmra.mxu1 %v3602_v58  ;;  %1484 = vmatmul.f32.gmra.mxu3 %v3607_v26  ;;  %v3633_v26 = vpop.permute.xlu0 %1229  ;;  %4176 = vst [vmem:[#allocation51_spill] sm:$0xff] %v3635_v47  ;;  %v3637_v54 = vpop.permute.xlu2 %1239 }
 0x24e   : > { %4175 = vst [vmem:[#allocation14_spill] sm:$0xff] %v3633_v26 }
 0x24f   : > { %4177 = vst [vmem:[#allocation52_spill] sm:$0xff] %v3637_v54 }
 0x254   : > { %1552 = vmatmul.f32.gmra.mxu2 %v4174_v12  ;;  %v3646_v12 = vpop.f32.mrf.mxu2  ;;  %v3650_v52 = vpop.permute.xlu1 %1249 }
 0x255   : > { %1445 = vmatmul.f32.gmra.mxu1 %v3621_v50  ;;  %1487 = vmatmul.f32.gmra.mxu3 %v3626_v48  ;;  %v3648_v9 = vpop.permute.xlu0 %1244  ;;  %v1300_v48 = vpop.f32.mrf.mxu0  ;;  %4179 = vst [vmem:[#allocation54_spill] sm:$0xff] %v3650_v52 }
 0x256   : > { %v3652_v41 = vpop.permute.xlu2 %1254 }
 0x257   : > { %4180 = vst [vmem:[#allocation55_spill] sm:$0xff] %v3652_v41  ;;  %v3671_v41 = vld [vmem:[%s4051_s3 + $0x1e8] sm:$0xff] }
 0x258   : > { %4183 = vst [vmem:[#allocation58_spill] sm:$0xff] %v3671_v41 }
 0x25c   : > { %1555 = vmatmul.f32.gmra.mxu2 %v3283_v59  ;;  %v1295_v59 = vadd.f32 %v1294_v22, %v3443_v42  ;;  %v3673_v49 = vpop.permute.xlu1 %1264  ;;  %v1337_v22 = vadd.f32 %v3401_v23, %v3559_v56  ;;  %v4191_v23 = vld [vmem:[#allocation4_spill] sm:$0xff] }
 0x25d   : > { %1490 = vmatmul.f32.gmra.mxu3 %v3642_v31  ;;  %v3662_v31 = vpop.f32.mrf.mxu2  ;;  %v3664_v38 = vpop.permute.xlu0 %1259  ;;  %4184 = vst [vmem:[#allocation59_spill] sm:$0xff] %v3673_v49  ;;  %v3689_v49 = vld [vmem:[%s4051_s3 + $0x1f8] sm:$0xff] }
 0x25e   : > { %4182 = vst [vmem:[#allocation57_spill] sm:$0xff] %v3664_v38  ;;  %v3666_v58 = vpop.f32.mrf.mxu0  ;;  %v1298_v38 = vadd.f32 %v1297_v19, %v3460_v25 }
 0x25f   : > { %4189 = vst [vmem:[#allocation62_spill] sm:$0xff] %v3689_v49 }
 0x264   : > { %1558 = vmatmul.f32.gmra.mxu2 %v3301_v34  ;;  %v3675_v34 = vpop.permute.xlu2 %1269 }
 0x265   : > { %1493 = vmatmul.f32.gmra.mxu3 %v3657_v53  ;;  %4185 = vst [vmem:[#allocation60_spill] sm:$0xff] %v3675_v34  ;;  %v4186_v53 = vld [vmem:[#allocation3_spill] sm:$0xff]  ;;  %v3691_v33 = vpop.permute.xlu0 %1274 }
 0x266   : > { %4190 = vst [vmem:[#allocation63_spill] sm:$0xff] %v3691_v33 }
 0x269   : > { %v1407_v50 = vpop.f32.mrf.mxu1 }
 0x26a   : > { %v1408_v14 = vadd.f32 %v1407_v50, %v1295_v59  ;;  %v3684_v59 = vpop.f32.mrf.mxu2 }
 0x26b   : > { %4188 = vst [vmem:[#allocation61_spill] sm:$0xff] %v3684_v59  ;;  %v4194_v59 = vld [vmem:[#allocation5_spill] sm:$0xff] }
 0x26c   : > { %1561 = vmatmul.f32.gmra.mxu2 %v4186_v53  ;;  %v1729_v34 = vmax.f32 %v1408_v14, 0.0  ;;  %v3699_v19 = vpop.permute.xlu2 %1832 }
 0x26d   : > { %1496 = vmatmul.f32.gmra.mxu3 %v3671_v41  ;;  %v3693_v41 = vpop.f32.mrf.mxu0  ;;  %4193 = vst [vmem:[#allocation64_spill] sm:$0xff] %v3699_v19 }
 0x270   : > { %v1449_v42 = vpop.f32.mrf.mxu3 }
 0x271   : > { %v3682_v50 = vadd.f32 %v1449_v42, %v1337_v22  ;;  %v3697_v42 = vpop.permute.xlu1 %1827  ;;  %v1340_v22 = vadd.f32 %v3436_v3, %v3561_v62  ;;  %v3712_v3 = vpop.permute.xlu0 %1837 }
 0x272   : > { %v1410_v16 = vpop.f32.mrf.mxu1  ;;  %4192 = vst [vmem:[#allocation4_spill] sm:$0xff] %v3697_v42  ;;  %v1985_v25 = vmul.f32 %v3697_v42, %v1729_v34 }
 0x273   : > { %4187 = vst [vmem:[#allocation3_spill] sm:$0xff] %v3682_v50  ;;  %v1411_v53 = vadd.f32 %v1410_v16, %v1298_v38  ;;  %v1301_v38 = vadd.f32 %v1300_v48, %v3462_v7  ;;  %v4205_v7 = vld [vmem:[#allocation11_spill] sm:$0xff] }
 0x274   : > { %1564 = vmatmul.f32.gmra.mxu2 %v4191_v23  ;;  %4195 = vst [vmem:[#allocation5_spill] sm:$0xff] %v3712_v3 }
 0x275   : > { %v1731_v56 = vmax.f32 %v1411_v53, 0.0  ;;  %1499 = vmatmul.f32.gmra.mxu3 %v3689_v49  ;;  %v3708_v49 = vpop.f32.mrf.mxu2  ;;  %v3714_v34 = vpop.f32.mrf.mxu0 }
 0x277   : > { %v1987_v16 = vmul.f32 %v3699_v19, %v1731_v56  ;;  %v1343_v56 = vadd.f32 %v3458_v28, %v3578_v27  ;;  %v4201_v27 = vld [vmem:[#allocation9_spill] sm:$0xff] }
 0x278   : > { %v1452_v14 = vpop.f32.mrf.mxu3 }
 0x279   : > { %v2049_v33 = vadd.f32 %v1987_v16, %v1985_v25  ;;  %v3706_v50 = vadd.f32 %v1452_v14, %v1340_v22  ;;  %v3762_v62 = vpop.permute.xlu0 %1852 }
 0x27a   : > { %v1413_v53 = vpop.f32.mrf.mxu1 }
 0x27b   : > { %v1414_v23 = vadd.f32 %v1413_v53, %v1301_v38  ;;  %v4196_v38 = vld [vmem:[#allocation6_spill] sm:$0xff] }
 0x27c   : > { %1567 = vmatmul.f32.gmra.mxu2 %v4194_v59  ;;  %v1346_v59 = vadd.f32 %v3479_v15, %v3590_v37  ;;  %v4199_v37 = vld [vmem:[#allocation8_spill] sm:$0xff] }
 0x27d   : > { %v1733_v52 = vmax.f32 %v1414_v23, 0.0  ;;  %1632 = vmatmul.f32.vlgmr.msrb.gmra.mxu3 %v3356_v20  ;;  %v3725_v20 = vpop.f32.mrf.mxu2  ;;  %v3729_v53 = vpop.f32.mrf.mxu0 }
 0x27f   : > { %v1989_v25 = vmul.f32 %v3712_v3, %v1733_v52 }
 0x280   : > { %v1455_v48 = vpop.f32.mrf.mxu3 }
 0x281   : > { %v3719_v22 = vadd.f32 %v2049_v33, %v1989_v25  ;;  %v3721_v16 = vadd.f32 %v1455_v48, %v1343_v56  ;;  %v4197_v33 = vld [vmem:[#allocation7_spill] sm:$0xff]  ;;  %v1349_v56 = vadd.f32 %v3500_v39, %v3592_v30  ;;  %v3777_v19 = vpop.permute.xlu0 %1867 }
 0x282   : > { %v1416_v14 = vpop.f32.mrf.mxu1 }
 0x284   : > { %1570 = vmatmul.f32.gmra.mxu2 %v4196_v38 }
 0x285   : > { %1635 = vmatmul.f32.gmra.mxu3 %v3383_v55  ;;  %v3737_v25 = vpop.f32.mrf.mxu2  ;;  %v1315_v38 = vpop.f32.mrf.mxu0 }
 0x286   : > { %4198 = vst [vmem:[#allocation6_spill] sm:$0xff] %v3737_v25 }
 0x288   : > { %v1458_v28 = vpop.f32.mrf.mxu3 }
 0x289   : > { %v3731_v23 = vadd.f32 %v1458_v28, %v1346_v59  ;;  %v1352_v59 = vadd.f32 %v3531_v13, %v3609_v2  ;;  %v3757_v13 = vpop.permute.xlu2 %1847  ;;  %v4203_v2 = vld [vmem:[#allocation10_spill] sm:$0xff] }
 0x28a   : > { %v1419_v52 = vpop.f32.mrf.mxu1 }
 0x28c   : > { %1573 = vmatmul.f32.gmra.mxu2 %v4197_v33 }
 0x28d   : > { %1638 = vmatmul.f32.gmra.mxu3 %v3406_v57  ;;  %v3747_v57 = vpop.f32.mrf.mxu2  ;;  %v1318_v30 = vpop.f32.mrf.mxu0 }
 0x28e   : > { %4200 = vst [vmem:[#allocation7_spill] sm:$0xff] %v3747_v57  ;;  %v3797_v57 = vpop.permute.xlu0 %1882 }
 0x290   : > { %v1461_v55 = vpop.f32.mrf.mxu3 }
 0x291   : > { %v3739_v48 = vadd.f32 %v1461_v55, %v1349_v56  ;;  %v3751_v56 = vpop.permute.xlu1 %1842 }
 0x292   : > { %v1422_v15 = vpop.f32.mrf.mxu1 }
 0x294   : > { %1576 = vmatmul.f32.gmra.mxu2 %v4199_v37  ;;  %v1355_v37 = vadd.f32 %v3555_v4, %v3614_v24  ;;  %v3771_v24 = vpop.permute.xlu2 %1862 }
 0x295   : > { %1641 = vmatmul.f32.gmra.mxu3 %v3427_v35 }
 0x298   : > { %v1464_v28 = vpop.f32.mrf.mxu3 }
 0x299   : > { %v3745_v33 = vadd.f32 %v1464_v28, %v1352_v59  ;;  %v3759_v28 = vpop.f32.mrf.mxu2  ;;  %v3767_v3 = vpop.permute.xlu1 %1857 }
 0x29a   : > { %v1425_v39 = vpop.f32.mrf.mxu1  ;;  %4202 = vst [vmem:[#allocation8_spill] sm:$0xff] %v3759_v28  ;;  %v4208_v28 = vld [vmem:[#allocation12_spill] sm:$0xff] }
 0x29c   : > { %1579 = vmatmul.f32.gmra.mxu2 %v4201_v27  ;;  %v1358_v27 = vadd.f32 %v3576_v46, %v3616_v44 }
 0x29d   : > { %1644 = vmatmul.f32.gmra.mxu3 %v3448_v11  ;;  %v1321_v11 = vpop.f32.mrf.mxu0 }
 0x2a0   : > { %v1467_v35 = vpop.f32.mrf.mxu3 }
 0x2a1   : > { %v3755_v55 = vadd.f32 %v1467_v35, %v1355_v37 }
 0x2a2   : > { %v1428_v59 = vpop.f32.mrf.mxu1 }
 0x2a4   : > { %1582 = vmatmul.f32.gmra.mxu2 %v4203_v2  ;;  %v3775_v2 = vpop.f32.mrf.mxu2 }
 0x2a5   : > { %1647 = vmatmul.f32.gmra.mxu3 %v3469_v43  ;;  %4206 = vst [vmem:[#allocation10_spill] sm:$0xff] %v3775_v2  ;;  %v1361_v43 = vadd.f32 %v3597_v1, %v3633_v26  ;;  %v1324_v46 = vpop.f32.mrf.mxu0  ;;  %v1364_v2 = vadd.f32 %v3628_v51, %v3635_v47  ;;  %v1307_v1 = vadd.f32 %v3693_v41, %v3481_v36 }
 0x2a6   : > { %v1313_v41 = vadd.f32 %v3729_v53, %v3495_v18 }
 0x2a8   : > { %v1470_v4 = vpop.f32.mrf.mxu3 }
 0x2a9   : > { %v3769_v37 = vadd.f32 %v1470_v4, %v1358_v27  ;;  %v3783_v27 = vpop.permute.xlu1 %1872 }
 0x2aa   : > { %v1431_v35 = vpop.f32.mrf.mxu1 }
 0x2ab   : > { %4204 = vst [vmem:[#allocation9_spill] sm:$0xff] %v3769_v37  ;;  %v4209_v37 = vld [vmem:[#allocation13_spill] sm:$0xff] }
 0x2ac   : > { %1585 = vmatmul.f32.gmra.mxu2 %v4205_v7  ;;  %v3787_v7 = vpop.permute.xlu2 %1877 }
 0x2ad   : > { %1650 = vmatmul.f32.gmra.mxu3 %v3486_v21  ;;  %v1304_v21 = vadd.f32 %v3666_v58, %v3464_v29  ;;  %v1327_v25 = vpop.f32.mrf.mxu0 }
 0x2b0   : > { %v1473_v44 = vpop.f32.mrf.mxu3 }
 0x2b1   : > { %v3781_v42 = vadd.f32 %v1473_v44, %v1361_v43  ;;  %v1417_v44 = vadd.f32 %v1416_v14, %v1304_v21  ;;  %v3795_v43 = vpop.f32.mrf.mxu2  ;;  %v3803_v29 = vpop.permute.xlu1 %1887 }
 0x2b2   : > { %v1434_v4 = vpop.f32.mrf.mxu1 }
 0x2b3   : > { %4207 = vst [vmem:[#allocation11_spill] sm:$0xff] %v3781_v42  ;;  %v1420_v42 = vadd.f32 %v1419_v52, %v1307_v1  ;;  %v1735_v51 = vmax.f32 %v1417_v44, 0.0 }
 0x2b4   : > { %1588 = vmatmul.f32.gmra.mxu2 %v4208_v28  ;;  %v3812_v52 = vpop.permute.xlu2 %1892 }
 0x2b5   : > { %1653 = vmatmul.f32.gmra.mxu3 %v3505_v5  ;;  %v1310_v5 = vadd.f32 %v3714_v34, %v3493_v40  ;;  %v1737_v14 = vmax.f32 %v1420_v42, 0.0  ;;  %v1367_v34 = vadd.f32 %v3646_v12, %v3637_v54  ;;  %v1991_v21 = vmul.f32 %v3751_v56, %v1735_v51  ;;  %v1330_v54 = vpop.f32.mrf.mxu0 }
 0x2b7   : > { %v1423_v47 = vadd.f32 %v1422_v15, %v1310_v5 }
 0x2b8   : > { %v1476_v26 = vpop.f32.mrf.mxu3 }
 0x2b9   : > { %v3799_v28 = vadd.f32 %v1476_v26, %v1364_v2  ;;  %v1316_v26 = vadd.f32 %v1315_v38, %v3512_v6  ;;  %v1426_v2 = vadd.f32 %v1425_v39, %v1313_v41  ;;  %v1739_v1 = vmax.f32 %v1423_v47, 0.0  ;;  %v3819_v42 = vpop.f32.mrf.mxu2  ;;  %v3822_v41 = vpop.permute.xlu0 %1897 }
 0x2ba   : > { %v1437_v58 = vpop.f32.mrf.mxu1  ;;  %v1322_v38 = vadd.f32 %v1321_v11, %v3519_v8  ;;  %v2051_v47 = vadd.f32 %v3719_v22, %v1991_v21  ;;  %v1328_v11 = vadd.f32 %v1327_v25, %v3538_v10 }
 0x2bb   : > { %v1429_v44 = vadd.f32 %v1428_v59, %v1316_v26  ;;  %v1741_v12 = vmax.f32 %v1426_v2, 0.0  ;;  %v1995_v51 = vmul.f32 %v3762_v62, %v1739_v1  ;;  %v1325_v59 = vadd.f32 %v1324_v46, %v3536_v61 }
 0x2bc   : > { %1591 = vmatmul.f32.gmra.mxu2 %v4209_v37  ;;  %v1319_v37 = vadd.f32 %v1318_v30, %v3517_v0  ;;  %v4210_v30 = vld [vmem:[#allocation15_spill] sm:$0xff]  ;;  %v1370_v2 = vadd.f32 %v3662_v31, %v3648_v9 }
 0x2bd   : > { %1656 = vmatmul.f32.gmra.mxu3 %v3524_v63  ;;  %v1993_v63 = vmul.f32 %v3757_v13, %v1737_v14  ;;  %v1743_v26 = vmax.f32 %v1429_v44, 0.0  ;;  %v1435_v14 = vadd.f32 %v1434_v4, %v1322_v38  ;;  %v1997_v22 = vmul.f32 %v3767_v3, %v1741_v12 }
 0x2be   : > { %v1432_v39 = vadd.f32 %v1431_v35, %v1319_v37  ;;  %v1438_v1 = vadd.f32 %v1437_v58, %v1325_v59  ;;  %v1333_v59 = vpop.f32.mrf.mxu0 }
 0x2bf   : > { %v2052_v35 = vadd.f32 %v2051_v47, %v1993_v63  ;;  %v1999_v4 = vmul.f32 %v3771_v24, %v1743_v26  ;;  %v1747_v44 = vmax.f32 %v1435_v14, 0.0  ;;  %v4211_v26 = vld [vmem:[#allocation54_spill] sm:$0xff]  ;;  %v4212_v14 = vld [vmem:[#allocation61_spill] sm:$0xff] }
 0x2c0   : > { %v1479_v15 = vpop.f32.mrf.mxu3  ;;  %v1745_v21 = vmax.f32 %v1432_v39, 0.0  ;;  %v1749_v47 = vmax.f32 %v1438_v1, 0.0 }
 0x2c1   : > { %v3816_v5 = vadd.f32 %v1479_v15, %v1367_v34  ;;  %v3829_v34 = vpop.permute.xlu1 %1902  ;;  %v1331_v15 = vadd.f32 %v1330_v54, %v3540_v45  ;;  %v2053_v37 = vadd.f32 %v2052_v35, %v1995_v51  ;;  %v3842_v39 = vpop.f32.mrf.mxu2  ;;  %v2003_v58 = vmul.f32 %v3783_v27, %v1747_v44 }
 0x2c2   : > { %v1440_v53 = vpop.f32.mrf.mxu1  ;;  %v2001_v31 = vmul.f32 %v3777_v19, %v1745_v21 }
 0x2c3   : > { %v2054_v63 = vadd.f32 %v2053_v37, %v1997_v22 }
 0x2c4   : > { %1594 = vmatmul.f32.gmra.mxu2 %v4210_v30  ;;  %v3839_v30 = vpop.permute.xlu2 %1907 }
 0x2c5   : > { %1659 = vmatmul.f32.gmra.mxu3 %v3545_v32  ;;  %v1441_v32 = vadd.f32 %v1440_v53, %v1328_v11  ;;  %v2055_v54 = vadd.f32 %v2054_v63, %v1999_v4  ;;  %v3847_v53 = vpop.permute.xlu0 %1912  ;;  %v1373_v11 = vadd.f32 %v4212_v14, %v4211_v26  ;;  %v4216_v26 = vld [vmem:[#allocation40_spill] sm:$0xff] }
 0x2c7   : > { %v1751_v51 = vmax.f32 %v1441_v32, 0.0  ;;  %v2056_v35 = vadd.f32 %v2055_v54, %v2001_v31  ;;  %v4214_v31 = vld [vmem:[#allocation16_spill] sm:$0xff] }
 0x2c8   : > { %v1482_v46 = vpop.f32.mrf.mxu3 }
 0x2c9   : > { %v3837_v38 = vadd.f32 %v1482_v46, %v1370_v2  ;;  %v2005_v2 = vmul.f32 %v3787_v7, %v1749_v47  ;;  %v3852_v21 = vpop.permute.xlu1 %1917  ;;  %v2057_v37 = vadd.f32 %v2056_v35, %v2003_v58  ;;  %v2007_v46 = vmul.f32 %v3797_v57, %v1751_v51  ;;  %v4215_v47 = vld [vmem:[#allocation3_spill] sm:$0xff]  ;;  %v3864_v58 = vpop.f32.mrf.mxu2 }
 0x2ca   : > { %v1443_v25 = vpop.f32.mrf.mxu1  ;;  %v4217_v51 = vld [vmem:[#allocation55_spill] sm:$0xff] }
 0x2cb   : > { %v1444_v12 = vadd.f32 %v1443_v25, %v1331_v15  ;;  %v2058_v44 = vadd.f32 %v2057_v37, %v2005_v2  ;;  %v1761_v37 = vmax.f32 %v3721_v16, 0.0 }
 0x2cc   : > { %1597 = vmatmul.f32.gmra.mxu2 %v3288_v17  ;;  %v4213_v17 = vld [vmem:[#allocation35_spill] sm:$0xff]  ;;  %v3859_v63 = vpop.permute.xlu2 %1922 }
 0x2cd   : > { %1662 = vmatmul.f32.gmra.mxu3 %v3566_v60  ;;  %v1753_v22 = vmax.f32 %v1444_v12, 0.0  ;;  %v1334_v15 = vadd.f32 %v1333_v59, %v4213_v17  ;;  %v1757_v12 = vmax.f32 %v4215_v47, 0.0  ;;  %v2059_v54 = vadd.f32 %v2058_v44, %v2007_v46 }
 0x2ce   : > { %v1376_v59 = vadd.f32 %v3708_v49, %v4217_v51  ;;  %v1763_v49 = vmax.f32 %v3731_v23, 0.0 }
 0x2cf   : > { %v2009_v32 = vmul.f32 %v3803_v29, %v1753_v22  ;;  %v3870_v22 = vpop.permute.xlu0 %1927 }
 0x2d0   : > { %v1485_v1 = vpop.f32.mrf.mxu3 }
 0x2d1   : > { %v3856_v4 = vadd.f32 %v1485_v1, %v1373_v11  ;;  %v1759_v11 = vmax.f32 %v3706_v50, 0.0  ;;  %v2060_v35 = vadd.f32 %v2059_v54, %v2009_v32  ;;  %v4218_v32 = vld [vmem:[#allocation17_spill] sm:$0xff] }
 0x2d2   : > { %v1446_v60 = vpop.f32.mrf.mxu1  ;;  %v4220_v54 = vld [vmem:[#allocation57_spill] sm:$0xff] }
 0x2d3   : > { %v1447_v25 = vadd.f32 %v1446_v60, %v1334_v15  ;;  %v2013_v15 = vmul.f32 %v3822_v41, %v1757_v12  ;;  %v2015_v44 = vmul.f32 %v3829_v34, %v1759_v11  ;;  %v4219_v12 = vld [vmem:[#allocation44_spill] sm:$0xff]  ;;  %v1767_v11 = vmax.f32 %v3745_v33, 0.0  ;;  %v4224_v33 = vld [vmem:[#allocation18_spill] sm:$0xff] }
 0x2d4   : > { %1600 = vmatmul.f32.gmra.mxu2 %v4214_v31  ;;  %v1765_v31 = vmax.f32 %v3739_v48, 0.0  ;;  %v3884_v16 = vpop.permute.xlu2 %1937  ;;  %v1769_v48 = vmax.f32 %v3755_v55, 0.0  ;;  %v4227_v55 = vld [vmem:[#allocation59_spill] sm:$0xff] }
 0x2d5   : > { %v1755_v14 = vmax.f32 %v1447_v25, 0.0  ;;  %1665 = vmatmul.f32.gmra.mxu3 %v4216_v26  ;;  %v3876_v26 = vpop.permute.xlu1 %1932  ;;  %v2017_v25 = vmul.f32 %v3839_v30, %v1761_v37 }
 0x2d7   : > { %v2011_v2 = vmul.f32 %v3812_v52, %v1755_v14  ;;  %v1379_v14 = vadd.f32 %v3725_v20, %v4220_v54  ;;  %v4226_v54 = vld [vmem:[#allocation49_spill] sm:$0xff] }
 0x2d8   : > { %v1488_v1 = vpop.f32.mrf.mxu3 }
 0x2d9   : > { %v2061_v46 = vadd.f32 %v2060_v35, %v2011_v2  ;;  %v3874_v60 = vadd.f32 %v1488_v1, %v1376_v59  ;;  %v2019_v59 = vmul.f32 %v3847_v53, %v1763_v49  ;;  %v3890_v35 = vpop.f32.mrf.mxu2  ;;  %v2021_v1 = vmul.f32 %v3852_v21, %v1765_v31 }
 0x2db   : > { %v2062_v50 = vadd.f32 %v2061_v46, %v2013_v15  ;;  %v3894_v46 = vpop.permute.xlu0 %1942 }
 0x2dc   : > { %1603 = vmatmul.f32.gmra.mxu2 %v4218_v32  ;;  %4221 = vst [vmem:[#allocation12_spill] sm:$0xff] %v3894_v46 }
 0x2dd   : > { %v2063_v47 = vadd.f32 %v2062_v50, %v2015_v44  ;;  %1668 = vmatmul.f32.gmra.mxu3 %v4219_v12  ;;  %v2023_v44 = vmul.f32 %v3859_v63, %v1767_v11  ;;  %v4222_v50 = vld [vmem:[#allocation9_spill] sm:$0xff]  ;;  %v3898_v49 = vpop.permute.xlu1 %1947  ;;  %v1775_v11 = vmax.f32 %v3799_v28, 0.0  ;;  %v4229_v28 = vld [vmem:[#allocation19_spill] sm:$0xff] }
 0x2de   : > { %v1771_v20 = vmax.f32 %v4222_v50, 0.0  ;;  %4223 = vst [vmem:[#allocation13_spill] sm:$0xff] %v3898_v49 }
 0x2df   : > { %v2064_v23 = vadd.f32 %v2063_v47, %v2017_v25  ;;  %v2025_v25 = vmul.f32 %v3870_v22, %v1769_v48  ;;  %v4225_v47 = vld [vmem:[#allocation11_spill] sm:$0xff]  ;;  %v1777_v48 = vmax.f32 %v3816_v5, 0.0 }
 0x2e0   : > { %v1491_v2 = vpop.f32.mrf.mxu3  ;;  %v1773_v12 = vmax.f32 %v4225_v47, 0.0 }
 0x2e1   : > { %v2065_v15 = vadd.f32 %v2064_v23, %v2019_v59  ;;  %v1492_v37 = vadd.f32 %v1491_v2, %v1379_v14  ;;  %v4228_v14 = vld [vmem:[#allocation6_spill] sm:$0xff]  ;;  %v2027_v23 = vmul.f32 %v3876_v26, %v1771_v20 }
 0x2e2   : > { %v1382_v59 = vadd.f32 %v4228_v14, %v4227_v55  ;;  %v2029_v50 = vmul.f32 %v3884_v16, %v1773_v12  ;;  %v4230_v55 = vld [vmem:[#allocation20_spill] sm:$0xff] }
 0x2e3   : > { %v2066_v32 = vadd.f32 %v2065_v15, %v2021_v1  ;;  %v3908_v1 = vpop.permute.xlu2 %1952  ;;  %v3916_v20 = vpop.permute.xlu0 %1957 }
 0x2e4   : > { %1606 = vmatmul.f32.gmra.mxu2 %v4224_v33 }
 0x2e5   : > { %v2067_v31 = vadd.f32 %v2066_v32, %v2023_v44  ;;  %1671 = vmatmul.f32.gmra.mxu3 %v4226_v54  ;;  %v3912_v44 = vpop.f32.mrf.mxu2  ;;  %v2031_v54 = vmul.f32 %v3894_v46, %v1775_v11  ;;  %v1779_v32 = vmax.f32 %v3837_v38, 0.0  ;;  %v3922_v5 = vpop.permute.xlu1 %1962  ;;  %v1783_v38 = vmax.f32 %v3874_v60, 0.0 }
 0x2e7   : > { %v2068_v2 = vadd.f32 %v2067_v31, %v2025_v25  ;;  %v2033_v25 = vmul.f32 %v3898_v49, %v1777_v48  ;;  %v1781_v31 = vmax.f32 %v3856_v4, 0.0  ;;  %v2035_v11 = vmul.f32 %v3908_v1, %v1779_v32 }
 0x2e8   : > { %v1494_v15 = vpop.f32.mrf.mxu3  ;;  %v1785_v48 = vmax.f32 %v1492_v37, 0.0  ;;  %v4237_v37 = vld [vmem:[#allocation63_spill] sm:$0xff] }
 0x2e9   : > { %v2069_v33 = vadd.f32 %v2068_v2, %v2027_v23  ;;  %v1495_v47 = vadd.f32 %v1494_v15, %v1382_v59  ;;  %v4231_v59 = vld [vmem:[#allocation60_spill] sm:$0xff]  ;;  %v4232_v23 = vld [vmem:[#allocation7_spill] sm:$0xff] }
 0x2ea   : > { %v1385_v2 = vadd.f32 %v4232_v23, %v4231_v59  ;;  %v4234_v23 = vld [vmem:[#allocation21_spill] sm:$0xff] }
 0x2eb   : > { %v2070_v14 = vadd.f32 %v2069_v33, %v2029_v50  ;;  %v2037_v33 = vmul.f32 %v3916_v20, %v1781_v31  ;;  %v3929_v4 = vpop.permute.xlu2 %1967  ;;  %v3937_v31 = vpop.permute.xlu0 %1972 }
 0x2ec   : > { %1609 = vmatmul.f32.gmra.mxu2 %v4229_v28  ;;  %4233 = vst [vmem:[#allocation15_spill] sm:$0xff] %v3929_v4  ;;  %v2041_v60 = vmul.f32 %v3929_v4, %v1785_v48  ;;  %v4242_v4 = vld [vmem:[#allocation25_spill] sm:$0xff] }
 0x2ed   : > { %v2071_v12 = vadd.f32 %v2070_v14, %v2031_v54  ;;  %1674 = vmatmul.f32.gmra.mxu3 %v4230_v55  ;;  %v2039_v55 = vmul.f32 %v3922_v5, %v1783_v38  ;;  %v1787_v14 = vmax.f32 %v1495_v47, 0.0  ;;  %v3932_v46 = vpop.f32.mrf.mxu2  ;;  %4236 = vst [vmem:[#allocation61_spill] sm:$0xff] %v3937_v31 }
 0x2ef   : > { %v2072_v15 = vadd.f32 %v2071_v12, %v2033_v25  ;;  %v4235_v12 = vld [vmem:[#allocation22_spill] sm:$0xff]  ;;  %v2043_v38 = vmul.f32 %v3937_v31, %v1787_v14 }
 0x2f0   : > { %v1497_v50 = vpop.f32.mrf.mxu3 }
 0x2f1   : > { %v2073_v28 = vadd.f32 %v2072_v15, %v2035_v11  ;;  %v1498_v49 = vadd.f32 %v1497_v50, %v1385_v2  ;;  %v4238_v2 = vld [vmem:[#allocation8_spill] sm:$0xff]  ;;  %v3942_v50 = vpop.permute.xlu1 %1977 }
 0x2f2   : > { %v1388_v11 = vadd.f32 %v4238_v2, %v4237_v37  ;;  %4239 = vst [vmem:[#allocation35_spill] sm:$0xff] %v3942_v50  ;;  %v4243_v2 = vld [vmem:[#allocation10_spill] sm:$0xff]  ;;  %v4244_v37 = vld [vmem:[#allocation24_spill] sm:$0xff] }
 0x2f3   : > { %v2074_v54 = vadd.f32 %v2073_v28, %v2037_v33  ;;  %v1789_v25 = vmax.f32 %v1498_v49, 0.0  ;;  %v3945_v49 = vpop.permute.xlu2 %1982 }
 0x2f4   : > { %1612 = vmatmul.f32.gmra.mxu2 %v4234_v23  ;;  %4240 = vst [vmem:[#allocation16_spill] sm:$0xff] %v3945_v49 }
 0x2f5   : > { %v2075_v32 = vadd.f32 %v2074_v54, %v2039_v55  ;;  %1677 = vmatmul.f32.gmra.mxu3 %v4235_v12  ;;  %v2045_v28 = vmul.f32 %v3942_v50, %v1789_v25  ;;  %v4241_v12 = vld [vmem:[#allocation23_spill] sm:$0xff]  ;;  %v4250_v50 = vld [vmem:[#allocation5_spill] sm:$0xff] }
 0x2f7   : > { %v2076_v15 = vadd.f32 %v2075_v32, %v2041_v60  ;;  %v1521_v32 = vadd.f32 %v4243_v2, %v4242_v4  ;;  %v1544_v4 = vpop.f32.mrf.mxu2 }
 0x2f8   : > { %v1500_v47 = vpop.f32.mrf.mxu3 }
 0x2f9   : > { %v2077_v33 = vadd.f32 %v2076_v15, %v2043_v38  ;;  %v1501_v55 = vadd.f32 %v1500_v47, %v1388_v11  ;;  %v4245_v15 = vld [vmem:[#allocation27_spill] sm:$0xff] }
 0x2fa   : > { %v1524_v25 = vadd.f32 %v3795_v43, %v4245_v15  ;;  %v4251_v15 = vld [vmem:[#allocation30_spill] sm:$0xff] }
 0x2fb   : > { %v2078_v54 = vadd.f32 %v2077_v33, %v2045_v28  ;;  %v1791_v48 = vmax.f32 %v1501_v55, 0.0  ;;  %v4246_v28 = vld [vmem:[#allocation4_spill] sm:$0xff] }
 0x2fd   : > { %v2047_v23 = vmul.f32 %v3945_v49, %v1791_v48  ;;  %1680 = vmatmul.f32.gmra.mxu3 %v4241_v12  ;;  %v4247_v48 = vld [vmem:[#allocation64_spill] sm:$0xff]  ;;  %v4248_v49 = vld [vmem:[#allocation26_spill] sm:$0xff] }
 0x2ff   : > { %v3951_v60 = vadd.f32 %v2078_v54, %v2047_v23  ;;  %v4249_v54 = vld [vmem:[#allocation28_spill] sm:$0xff] }
 0x300   : > { %v1633_v14 = vpop.f32.mrf.mxu3  ;;  %v1527_v23 = vadd.f32 %v3819_v42, %v4249_v54  ;;  %v1533_v42 = vadd.f32 %v3864_v58, %v3481_v36  ;;  %v4255_v36 = vld [vmem:[#allocation33_spill] sm:$0xff]  ;;  %v1539_v58 = vadd.f32 %v3912_v44, %v3495_v18  ;;  %v1545_v18 = vadd.f32 %v1544_v4, %v3517_v0 }
 0x301   : > { %v1634_v31 = vadd.f32 %v1633_v14, %v1521_v32 }
 0x303   : > { %v1730_v38 = vmax.f32 %v1634_v31, 0.0  ;;  %v4252_v31 = vld [vmem:[#allocation29_spill] sm:$0xff] }
 0x305   : > { %1683 = vmatmul.f32.gmra.mxu3 %v4244_v37  ;;  %v1986_v55 = vmul.f32 %v4246_v28, %v1730_v38  ;;  %v1547_v38 = vpop.f32.mrf.mxu2 }
 0x308   : > { %v1636_v11 = vpop.f32.mrf.mxu3 }
 0x309   : > { %v1637_v47 = vadd.f32 %v1636_v11, %v1524_v25  ;;  %v1530_v25 = vadd.f32 %v3842_v39, %v4252_v31  ;;  %v4254_v39 = vld [vmem:[#allocation32_spill] sm:$0xff] }
 0x30b   : > { %v1732_v33 = vmax.f32 %v1637_v47, 0.0 }
 0x30d   : > { %v1988_v12 = vmul.f32 %v4247_v48, %v1732_v33  ;;  %1686 = vmatmul.f32.gmra.mxu3 %v4248_v49  ;;  %v4253_v48 = vld [vmem:[#allocation31_spill] sm:$0xff]  ;;  %v1550_v54 = vpop.f32.mrf.mxu2 }
 0x30e   : > { %v1551_v0 = vadd.f32 %v1550_v54, %v3536_v61 }
 0x30f   : > { %v2086_v2 = vadd.f32 %v1988_v12, %v1986_v55 }
 0x310   : > { %v1639_v32 = vpop.f32.mrf.mxu3 }
 0x311   : > { %v1640_v37 = vadd.f32 %v1639_v32, %v1527_v23 }
 0x313   : > { %v1734_v14 = vmax.f32 %v1640_v37, 0.0 }
 0x315   : > { %v1990_v43 = vmul.f32 %v4250_v50, %v1734_v14  ;;  %1689 = vmatmul.f32.gmra.mxu3 %v4251_v15  ;;  %v1553_v15 = vpop.f32.mrf.mxu2 }
 0x317   : > { %v2087_v11 = vadd.f32 %v2086_v2, %v1990_v43  ;;  %v1536_v2 = vadd.f32 %v3890_v35, %v3493_v40  ;;  %v1542_v35 = vadd.f32 %v3932_v46, %v3512_v6  ;;  %v1548_v6 = vadd.f32 %v1547_v38, %v3519_v8 }
 0x318   : > { %v1642_v47 = vpop.f32.mrf.mxu3  ;;  %v1554_v8 = vadd.f32 %v1553_v15, %v3538_v10 }
 0x319   : > { %v1643_v33 = vadd.f32 %v1642_v47, %v1530_v25 }
 0x31b   : > { %v1736_v49 = vmax.f32 %v1643_v33, 0.0 }
 0x31d   : > { %v1992_v28 = vmul.f32 %v3751_v56, %v1736_v49  ;;  %1692 = vmatmul.f32.gmra.mxu3 %v4253_v48  ;;  %v4256_v49 = vld [vmem:[#allocation34_spill] sm:$0xff]  ;;  %v1556_v40 = vpop.f32.mrf.mxu2 }
 0x31e   : > { %v1557_v54 = vadd.f32 %v1556_v40, %v3540_v45  ;;  %v4264_v45 = vld [vmem:[#allocation36_spill] sm:$0xff] }
 0x31f   : > { %v2088_v55 = vadd.f32 %v2087_v11, %v1992_v28 }
 0x320   : > { %v1645_v12 = vpop.f32.mrf.mxu3 }
 0x321   : > { %v1646_v50 = vadd.f32 %v1645_v12, %v1533_v42  ;;  %v4257_v12 = vld [vmem:[#allocation38_spill] sm:$0xff] }
 0x323   : > { %v1738_v23 = vmax.f32 %v1646_v50, 0.0 }
 0x325   : > { %v1994_v32 = vmul.f32 %v3757_v13, %v1738_v23  ;;  %1695 = vmatmul.f32.gmra.mxu3 %v4254_v39  ;;  %v1559_v50 = vpop.f32.mrf.mxu2 }
 0x326   : > { %v1560_v10 = vadd.f32 %v1559_v50, %v4213_v17  ;;  %v4266_v17 = vld [vmem:[#allocation37_spill] sm:$0xff] }
 0x327   : > { %v2089_v37 = vadd.f32 %v2088_v55, %v1994_v32 }
 0x328   : > { %v1648_v14 = vpop.f32.mrf.mxu3 }
 0x329   : > { %v1649_v56 = vadd.f32 %v1648_v14, %v1536_v2  ;;  %v4258_v2 = vld [vmem:[#allocation41_spill] sm:$0xff] }
 0x32b   : > { %v1740_v43 = vmax.f32 %v1649_v56, 0.0 }
 0x32d   : > { %v1996_v31 = vmul.f32 %v3762_v62, %v1740_v43  ;;  %1698 = vmatmul.f32.gmra.mxu3 %v4255_v36  ;;  %v1562_v56 = vpop.f32.mrf.mxu2 }
 0x32e   : > { %v1563_v40 = vadd.f32 %v1562_v56, %v4264_v45 }
 0x32f   : > { %v2090_v25 = vadd.f32 %v2089_v37, %v1996_v31  ;;  %v4259_v31 = vld [vmem:[#allocation45_spill] sm:$0xff] }
 0x330   : > { %v1651_v11 = vpop.f32.mrf.mxu3 }
 0x331   : > { %v1652_v13 = vadd.f32 %v1651_v11, %v1539_v58 }
 0x333   : > { %v1742_v47 = vmax.f32 %v1652_v13, 0.0  ;;  %v4260_v13 = vld [vmem:[#allocation50_spill] sm:$0xff] }
 0x335   : > { %v1998_v33 = vmul.f32 %v3767_v3, %v1742_v47  ;;  %1701 = vmatmul.f32.gmra.mxu3 %v4256_v49 }
 0x337   : > { %v2091_v28 = vadd.f32 %v2090_v25, %v1998_v33 }
 0x338   : > { %v1654_v48 = vpop.f32.mrf.mxu3 }
 0x339   : > { %v1655_v62 = vadd.f32 %v1654_v48, %v1542_v35  ;;  %v4261_v35 = vld [vmem:[#allocation53_spill] sm:$0xff] }
 0x33b   : > { %v1744_v42 = vmax.f32 %v1655_v62, 0.0 }
 0x33d   : > { %v2000_v55 = vmul.f32 %v3771_v24, %v1744_v42  ;;  %1704 = vmatmul.f32.gmra.mxu3 %v4257_v12 }
 0x33f   : > { %v2092_v44 = vadd.f32 %v2091_v28, %v2000_v55  ;;  %v4262_v55 = vld [vmem:[#allocation56_spill] sm:$0xff] }
 0x340   : > { %v1657_v23 = vpop.f32.mrf.mxu3 }
 0x341   : > { %v1658_v3 = vadd.f32 %v1657_v23, %v1545_v18 }
 0x343   : > { %v1746_v32 = vmax.f32 %v1658_v3, 0.0  ;;  %v4263_v3 = vld [vmem:[#allocation58_spill] sm:$0xff] }
 0x345   : > { %v2002_v39 = vmul.f32 %v3777_v19, %v1746_v32  ;;  %1707 = vmatmul.f32.gmra.mxu3 %v4258_v2  ;;  %v1565_v19 = vpop.f32.mrf.mxu2 }
 0x346   : > { %v1566_v50 = vadd.f32 %v1565_v19, %v4266_v17 }
 0x347   : > { %v2093_v46 = vadd.f32 %v2092_v44, %v2002_v39 }
 0x348   : > { %v1660_v37 = vpop.f32.mrf.mxu3 }
 0x349   : > { %v1661_v14 = vadd.f32 %v1660_v37, %v1548_v6  ;;  %v4265_v37 = vld [vmem:[#allocation62_spill] sm:$0xff] }
 0x34b   : > { %v1748_v24 = vmax.f32 %v1661_v14, 0.0 }
 0x34d   : > { %v2004_v43 = vmul.f32 %v3783_v27, %v1748_v24  ;;  %1710 = vmatmul.f32.gmra.mxu3 %v4259_v31  ;;  %v1568_v61 = vpop.f32.mrf.mxu2 }
 0x34f   : > { %v2094_v4 = vadd.f32 %v2093_v46, %v2004_v43 }
 0x350   : > { %v1663_v36 = vpop.f32.mrf.mxu3 }
 0x351   : > { %v1664_v58 = vadd.f32 %v1663_v36, %v1551_v0 }
 0x353   : > { %v1750_v25 = vmax.f32 %v1664_v58, 0.0 }
 0x355   : > { %v2006_v11 = vmul.f32 %v3787_v7, %v1750_v25  ;;  %1713 = vmatmul.f32.gmra.mxu3 %v4260_v13  ;;  %v1571_v12 = vpop.f32.mrf.mxu2 }
 0x357   : > { %v2095_v38 = vadd.f32 %v2094_v4, %v2006_v11  ;;  %v4267_v4 = vld [vmem:[#allocation39_spill] sm:$0xff] }
 0x358   : > { %v1666_v47 = vpop.f32.mrf.mxu3  ;;  %v1569_v56 = vadd.f32 %v1568_v61, %v4267_v4  ;;  %v4273_v4 = vld [vmem:[#allocation14_spill] sm:$0xff] }
 0x359   : > { %v1667_v33 = vadd.f32 %v1666_v47, %v1554_v8  ;;  %v4268_v8 = vld [vmem:[#allocation42_spill] sm:$0xff] }
 0x35b   : > { %v1752_v49 = vmax.f32 %v1667_v33, 0.0 }
 0x35d   : > { %v2008_v27 = vmul.f32 %v3797_v57, %v1752_v49  ;;  %1716 = vmatmul.f32.gmra.mxu3 %v4261_v35  ;;  %v1574_v6 = vpop.f32.mrf.mxu2  ;;  %v4269_v35 = vld [vmem:[#allocation43_spill] sm:$0xff] }
 0x35f   : > { %v2096_v28 = vadd.f32 %v2095_v38, %v2008_v27  ;;  %v1572_v38 = vadd.f32 %v1571_v12, %v4268_v8 }
 0x360   : > { %v1669_v48 = vpop.f32.mrf.mxu3 }
 0x361   : > { %v1670_v62 = vadd.f32 %v1669_v48, %v1557_v54  ;;  %v1575_v54 = vadd.f32 %v1574_v6, %v4269_v35 }
 0x363   : > { %v1754_v42 = vmax.f32 %v1670_v62, 0.0 }
 0x365   : > { %v2010_v7 = vmul.f32 %v3803_v29, %v1754_v42  ;;  %1719 = vmatmul.f32.gmra.mxu3 %v4262_v55 }
 0x367   : > { %v2097_v15 = vadd.f32 %v2096_v28, %v2010_v7  ;;  %v4270_v7 = vld [vmem:[#allocation46_spill] sm:$0xff] }
 0x368   : > { %v1672_v18 = vpop.f32.mrf.mxu3 }
 0x369   : > { %v1673_v44 = vadd.f32 %v1672_v18, %v1560_v10 }
 0x36b   : > { %v1756_v57 = vmax.f32 %v1673_v44, 0.0 }
 0x36d   : > { %v2012_v23 = vmul.f32 %v3812_v52, %v1756_v57  ;;  %1722 = vmatmul.f32.gmra.mxu3 %v4263_v3  ;;  %v1577_v52 = vpop.f32.mrf.mxu2  ;;  %v4271_v57 = vld [vmem:[#allocation47_spill] sm:$0xff] }
 0x36f   : > { %v2098_v32 = vadd.f32 %v2097_v15, %v2012_v23 }
 0x370   : > { %v1675_v39 = vpop.f32.mrf.mxu3 }
 0x371   : > { %v1676_v2 = vadd.f32 %v1675_v39, %v1563_v40 }
 0x373   : > { %v1758_v29 = vmax.f32 %v1676_v2, 0.0 }
 0x375   : > { %v2014_v46 = vmul.f32 %v3822_v41, %v1758_v29  ;;  %1725 = vmatmul.f32.gmra.mxu3 %v4265_v37  ;;  %v1580_v41 = vpop.f32.mrf.mxu2 }
 0x377   : > { %v2099_v14 = vadd.f32 %v2098_v32, %v2014_v46 }
 0x378   : > { %v1678_v24 = vpop.f32.mrf.mxu3 }
 0x379   : > { %v1679_v43 = vadd.f32 %v1678_v24, %v1566_v50 }
 0x37b   : > { %v1760_v31 = vmax.f32 %v1679_v43, 0.0 }
 0x37d   : > { %v2016_v0 = vmul.f32 %v3829_v34, %v1760_v31  ;;  %v1583_v28 = vpop.f32.mrf.mxu2 }
 0x37f   : > { %v2100_v36 = vadd.f32 %v2099_v14, %v2016_v0 }
 0x380   : > { %v1681_v58 = vpop.f32.mrf.mxu3 }
 0x381   : > { %v1682_v25 = vadd.f32 %v1681_v58, %v1569_v56 }
 0x383   : > { %v1762_v11 = vmax.f32 %v1682_v25, 0.0  ;;  %v4274_v25 = vld [vmem:[#allocation51_spill] sm:$0xff] }
 0x385   : > { %v2018_v13 = vmul.f32 %v3839_v30, %v1762_v11  ;;  %v1578_v30 = vadd.f32 %v1577_v52, %v4270_v7  ;;  %v1586_v12 = vpop.f32.mrf.mxu2  ;;  %v4272_v52 = vld [vmem:[#allocation48_spill] sm:$0xff] }
 0x386   : > { %v1584_v0 = vadd.f32 %v1583_v28, %v4272_v52  ;;  %v1587_v56 = vadd.f32 %v1586_v12, %v4273_v4  ;;  %v2080_v52 = vrot.slane %v3951_v60, 4 }
 0x387   : > { %v2101_v47 = vadd.f32 %v2100_v36, %v2018_v13 }
 0x388   : > { %v1684_v19 = vpop.f32.mrf.mxu3 }
 0x389   : > { %v1685_v33 = vadd.f32 %v1684_v19, %v1572_v38 }
 0x38b   : > { %v1764_v49 = vmax.f32 %v1685_v33, 0.0 }
 0x38d   : > { %v2020_v27 = vmul.f32 %v3847_v53, %v1764_v49  ;;  %v1581_v53 = vadd.f32 %v1580_v41, %v4271_v57  ;;  %v1589_v32 = vpop.f32.mrf.mxu2  ;;  %v4275_v41 = vld [vmem:[#allocation52_spill] sm:$0xff]  ;;  %v4279_v57 = vld [vmem:[#allocation59_spill] sm:$0xff] }
 0x38e   : > { %v1590_v11 = vadd.f32 %v1589_v32, %v4274_v25 }
 0x38f   : > { %v2102_v34 = vadd.f32 %v2101_v47, %v2020_v27  ;;  %v4276_v27 = vld [vmem:[#allocation54_spill] sm:$0xff] }
 0x390   : > { %v1687_v61 = vpop.f32.mrf.mxu3 }
 0x391   : > { %v1688_v48 = vadd.f32 %v1687_v61, %v1575_v54 }
 0x393   : > { %v1766_v62 = vmax.f32 %v1688_v48, 0.0 }
 0x395   : > { %v2022_v42 = vmul.f32 %v3852_v21, %v1766_v62  ;;  %v1592_v6 = vpop.f32.mrf.mxu2 }
 0x396   : > { %v1593_v8 = vadd.f32 %v1592_v6, %v4275_v41 }
 0x397   : > { %v2103_v55 = vadd.f32 %v2102_v34, %v2022_v42 }
 0x398   : > { %v1690_v10 = vpop.f32.mrf.mxu3 }
 0x399   : > { %v1691_v15 = vadd.f32 %v1690_v10, %v1578_v30  ;;  %v4277_v30 = vld [vmem:[#allocation57_spill] sm:$0xff] }
 0x39b   : > { %v1768_v18 = vmax.f32 %v1691_v15, 0.0 }
 0x39d   : > { %v2024_v44 = vmul.f32 %v3859_v63, %v1768_v18  ;;  %v1595_v46 = vpop.f32.mrf.mxu2 }
 0x39e   : > { %v1596_v19 = vadd.f32 %v1595_v46, %v3648_v9  ;;  %v4278_v9 = vld [vmem:[#allocation12_spill] sm:$0xff] }
 0x39f   : > { %v2104_v23 = vadd.f32 %v2103_v55, %v2024_v44 }
 0x3a0   : > { %v1693_v3 = vpop.f32.mrf.mxu3 }
 0x3a1   : > { %v1694_v45 = vadd.f32 %v1693_v3, %v1581_v53 }
 0x3a3   : > { %v1770_v40 = vmax.f32 %v1694_v45, 0.0 }
 0x3a5   : > { %v2026_v39 = vmul.f32 %v3870_v22, %v1770_v40  ;;  %v1598_v50 = vpop.f32.mrf.mxu2 }
 0x3a6   : > { %v1599_v35 = vadd.f32 %v1598_v50, %v4276_v27 }
 0x3a7   : > { %v2105_v2 = vadd.f32 %v2104_v23, %v2026_v39  ;;  %v4280_v23 = vld [vmem:[#allocation13_spill] sm:$0xff] }
 0x3a8   : > { %v1696_v21 = vpop.f32.mrf.mxu3 }
 0x3a9   : > { %v1697_v36 = vadd.f32 %v1696_v21, %v1584_v0 }
 0x3ab   : > { %v1772_v38 = vmax.f32 %v1697_v36, 0.0 }
 0x3ad   : > { %v1601_v24 = vpop.f32.mrf.mxu2  ;;  %v2028_v54 = vmul.f32 %v3876_v26, %v1772_v38  ;;  %v4285_v38 = vld [vmem:[#allocation16_spill] sm:$0xff] }
 0x3ae   : > { %v1602_v48 = vadd.f32 %v1601_v24, %v4217_v51 }
 0x3af   : > { %v2106_v15 = vadd.f32 %v2105_v2, %v2028_v54 }
 0x3b0   : > { %v1699_v29 = vpop.f32.mrf.mxu3 }
 0x3b1   : > { %v1700_v13 = vadd.f32 %v1699_v29, %v1587_v56  ;;  %v4283_v56 = vld [vmem:[#allocation61_spill] sm:$0xff] }
 0x3b3   : > { %v1774_v33 = vmax.f32 %v1700_v13, 0.0 }
 0x3b5   : > { %v1604_v43 = vpop.f32.mrf.mxu2  ;;  %v2030_v62 = vmul.f32 %v3884_v16, %v1774_v33 }
 0x3b6   : > { %v1605_v55 = vadd.f32 %v1604_v43, %v4277_v30  ;;  %v4281_v43 = vld [vmem:[#allocation15_spill] sm:$0xff] }
 0x3b7   : > { %v2107_v26 = vadd.f32 %v2106_v15, %v2030_v62 }
 0x3b8   : > { %v1702_v37 = vpop.f32.mrf.mxu3 }
 0x3b9   : > { %v1703_v47 = vadd.f32 %v1702_v37, %v1590_v11 }
 0x3bb   : > { %v1776_v34 = vmax.f32 %v1703_v47, 0.0 }
 0x3bd   : > { %v1607_v58 = vpop.f32.mrf.mxu2  ;;  %v2032_v12 = vmul.f32 %v4278_v9, %v1776_v34 }
 0x3be   : > { %v1608_v53 = vadd.f32 %v1607_v58, %v4279_v57 }
 0x3bf   : > { %v2108_v16 = vadd.f32 %v2107_v26, %v2032_v12 }
 0x3c0   : > { %v1705_v17 = vpop.f32.mrf.mxu3 }
 0x3c1   : > { %v1706_v49 = vadd.f32 %v1705_v17, %v1593_v8 }
 0x3c3   : > { %v1778_v42 = vmax.f32 %v1706_v49, 0.0 }
 0x3c5   : > { %v1610_v10 = vpop.f32.mrf.mxu2  ;;  %v2034_v3 = vmul.f32 %v4280_v23, %v1778_v42 }
 0x3c6   : > { %v1611_v51 = vadd.f32 %v1610_v10, %v4231_v59 }
 0x3c7   : > { %v2109_v2 = vadd.f32 %v2108_v16, %v2034_v3 }
 0x3c8   : > { %v1708_v14 = vpop.f32.mrf.mxu3 }
 0x3c9   : > { %v1709_v28 = vadd.f32 %v1708_v14, %v1596_v19 }
 0x3cb   : > { %v1780_v18 = vmax.f32 %v1709_v28, 0.0 }
 0x3cd   : > { %v2036_v32 = vmul.f32 %v3908_v1, %v1780_v18  ;;  %v1613_v24 = vpop.f32.mrf.mxu2  ;;  %v4282_v1 = vld [vmem:[#allocation63_spill] sm:$0xff] }
 0x3ce   : > { %v1614_v0 = vadd.f32 %v1613_v24, %v4282_v1 }
 0x3cf   : > { %v2110_v17 = vadd.f32 %v2109_v2, %v2036_v32 }
 0x3d0   : > { %v1711_v63 = vpop.f32.mrf.mxu3 }
 0x3d1   : > { %v1712_v7 = vadd.f32 %v1711_v63, %v1599_v35 }
 0x3d3   : > { %v1782_v45 = vmax.f32 %v1712_v7, 0.0  ;;  %v2138_v7 = vlaneseq }
 0x3d5   : > { %v2038_v29 = vmul.f32 %v3916_v20, %v1782_v45  ;;  %vm2140_vm2 = vcmp.lt.s32.totalorder %v2138_v7, 256 }
 0x3d7   : > { %v2111_v63 = vadd.f32 %v2110_v17, %v2038_v29 }
 0x3d8   : > { %v1714_v31 = vpop.f32.mrf.mxu3 }
 0x3d9   : > { %v1715_v44 = vadd.f32 %v1714_v31, %v1602_v48 }
 0x3db   : > { %v1784_v39 = vmax.f32 %v1715_v44, 0.0 }
 0x3dd   : > { %v2040_v50 = vmul.f32 %v3922_v5, %v1784_v39  ;;  %v2081_v5 = vadd.f32 %v2080_v52, %v3951_v60 }
 0x3df   : > { %v2112_v4 = vadd.f32 %v2111_v63, %v2040_v50  ;;  %v2082_v19 = vrot.slane %v2081_v5, 2 }
 0x3e0   : > { %v1717_v22 = vpop.f32.mrf.mxu3 }
 0x3e1   : > { %v1718_v40 = vadd.f32 %v1717_v22, %v1605_v55  ;;  %v4284_v22 = vld [vmem:[#allocation35_spill] sm:$0xff]  ;;  %v2083_v27 = vadd.f32 %v2082_v19, %v2081_v5 }
 0x3e3   : > { %v1786_v46 = vmax.f32 %v1718_v40, 0.0  ;;  %v2084_v34 = vrot.slane %v2083_v27, 1 }
 0x3e5   : > { %v2042_v31 = vmul.f32 %v4281_v43, %v1786_v46  ;;  %v2085_v60 = vadd.f32 %v2084_v34, %v2083_v27 }
 0x3e7   : > { %v2113_v58 = vadd.f32 %v2112_v4, %v2042_v31 }
 0x3e8   : > { %v1720_v61 = vpop.f32.mrf.mxu3 }
 0x3e9   : > { %v1721_v21 = vadd.f32 %v1720_v61, %v1608_v53  ;;  %v2127_v61 = vpop.permute.xlu0 %2126 }
 0x3ea   : > { %v2129_v62 = vperm.slane %v2127_v61, 0 }
 0x3eb   : > { %v1788_v14 = vmax.f32 %v1721_v21, 0.0 }
 0x3ec   : > { %v2130_v55 = vadd.f32 %v2129_v62, %v2085_v60 }
 0x3ed   : > { %v2044_v36 = vmul.f32 %v4283_v56, %v1788_v14 }
 0x3ef   : > { %v2114_v13 = vadd.f32 %v2113_v58, %v2044_v36 }
 0x3f0   : > { %v1723_v6 = vpop.f32.mrf.mxu3 }
 0x3f1   : > { %v1724_v37 = vadd.f32 %v1723_v6, %v1611_v51 }
 0x3f3   : > { %v1790_v59 = vmax.f32 %v1724_v37, 0.0 }
 0x3f5   : > { %v2046_v25 = vmul.f32 %v4284_v22, %v1790_v59 }
 0x3f7   : > { %v2115_v8 = vadd.f32 %v2114_v13, %v2046_v25 }
 0x3f8   : > { %v1726_v20 = vpop.f32.mrf.mxu3 }
 0x3f9   : > { %v1727_v11 = vadd.f32 %v1726_v20, %v1614_v0 }
 0x3fb   : > { %v1792_v41 = vmax.f32 %v1727_v11, 0.0 }
 0x3fd   : > { %v2048_v47 = vmul.f32 %v4285_v38, %v1792_v41 }
 0x3ff   : > { %v2116_v33 = vadd.f32 %v2115_v8, %v2048_v47 }
 0x401   : > { %v2117_v49 = vrot.slane %v2116_v33, 4 }
 0x403   : > { %v2118_v35 = vadd.f32 %v2117_v49, %v2116_v33 }
 0x405   : > { %v2119_v54 = vrot.slane %v2118_v35, 2 }
 0x407   : > { %v2120_v28 = vadd.f32 %v2119_v54, %v2118_v35 }
 0x409   : > { %v2121_v48 = vrot.slane %v2120_v28, 1 }
 0x40b   : > { %v2122_v42 = vadd.f32 %v2121_v48, %v2120_v28 }
 0x40d   : > { %v2131_v30 = vadd.f32 %v2129_v62, %v2122_v42 }
 0x40f   : > { %v2134_v10 = vrot.slane %v2131_v30, 7 }
 0x411   : > { %v2136_v15 = vsel %vm2135_vm1, %v2130_v55, %v2134_v10 }
 0x412   : > { %2142 = vst.msk [vmem:[%s280_s23] sm:$0x3] %vm2140_vm2, %v2136_v15 }
 0x413 PF: > { %s19_s26 = sadd.s32 1, %s2349_s26  }
 0x414   : > { %p16_p5 = scmp.ge.s32.totalorder %s19_s26, 4  }
 0x416   :  { %18 = sbr.rel (!%p16_p5) target bundleno = 3 (0x3), region = 78 }

</bundles_post_ra>
